<compile_context>
chip_gen: v7x
topology: tpu7x:2x2x1
jax: 0.10.0
libtpu: 0.0.40
codegen_flags: <defaults>
</compile_context>

<pallas_src>
import jax
import jax.numpy as jnp
from jax.experimental import pallas as pl
from jax.experimental.pallas import tpu as pltpu


def _round_up(x, m):
    return (x + m - 1) // m * m


# --------------------------------------------------------------------------
# Fused multi-block TemporalBlock kernel (one time tile per grid step)
# --------------------------------------------------------------------------
def _make_fused_tcn_kernel(TL, K, block_cfgs):
    """block_cfgs: list of dicts with static keys: dilation, E, has_down."""
    n_blocks = len(block_cfgs)

    def kernel(*refs):
        # ---- unpack refs: x, per-block weights, output, per-block carries --
        idx = 0
        x_ref = refs[idx]; idx += 1
        blk_refs = []
        for cfg in block_cfgs:
            w1 = refs[idx]; b1 = refs[idx + 1]
            w2 = refs[idx + 2]; b2 = refs[idx + 3]
            idx += 4
            if cfg["has_down"]:
                wd = refs[idx]; bd = refs[idx + 1]; idx += 2
            else:
                wd, bd = None, None
            blk_refs.append((w1, b1, w2, b2, wd, bd))
        o_ref = refs[idx]; idx += 1
        carries = refs[idx:]
        assert len(carries) == 2 * n_blocks

        t = pl.program_id(1)

        # At the first time tile of every batch element the causal history is
        # all zeros: this reproduces Conv1d's left zero padding + Chomp1d.
        @pl.when(t == 0)
        def _():
            for c in carries:
                c[...] = jnp.zeros_like(c)

        cur = x_ref[0]                                   # (TL, Cp0) bf16
        for bi, cfg in enumerate(block_cfgs):
            w1, b1, w2, b2, wd, bd = blk_refs[bi]
            xcar = carries[2 * bi]                       # (E, Cin)  bf16
            hcar = carries[2 * bi + 1]                   # (E, Cmid) bf16
            d = cfg["dilation"]
            E = cfg["E"]                                 # halo rows (mult of 8)

            cur_bf = cur.astype(jnp.bfloat16)

            # ---- conv1 (causal, dilated): one K-folded MXU matmul ---------
            xe = jnp.concatenate([xcar[...], cur_bf], axis=0)   # (E+TL, Cin)
            xcar[...] = xe[TL:TL + E, :]                 # carry for next tile
            xcat = jnp.concatenate(
                [xe[E - (K - 1 - j) * d: E - (K - 1 - j) * d + TL, :]
                 for j in range(K)], axis=-1)            # (TL, K*Cin)
            h1 = jnp.dot(xcat, w1[...], preferred_element_type=jnp.float32)
            h1 = jnp.maximum(h1 + b1[...], 0.0)          # relu; dropout == id
            h1_bf = h1.astype(jnp.bfloat16)

            # ---- conv2 (causal, dilated) ----------------------------------
            he = jnp.concatenate([hcar[...], h1_bf], axis=0)    # (E+TL, Cmid)
            hcar[...] = he[TL:TL + E, :]
            hcat = jnp.concatenate(
                [he[E - (K - 1 - j) * d: E - (K - 1 - j) * d + TL, :]
                 for j in range(K)], axis=-1)            # (TL, K*Cmid)
            h2 = jnp.dot(hcat, w2[...], preferred_element_type=jnp.float32)
            h2 = jnp.maximum(h2 + b2[...], 0.0)

            # ---- residual branch (1x1 conv iff channel count changes) -----
            if cfg["has_down"]:
                res = jnp.dot(cur_bf, wd[...],
                              preferred_element_type=jnp.float32) + bd[...]
            else:
                res = cur.astype(jnp.float32)

            cur = jnp.maximum(h2 + res, 0.0)             # (TL, Cout) f32

        o_ref[0] = cur.astype(o_ref.dtype)

    return kernel


def temporal_blocks_fused_pallas(x_blc, blocks, *, ksize, tl):
    """Chain of fused TemporalBlocks in ONE pallas_call.

    x_blc  : (B, L_pad, Cp0) bf16, channel-padded (lane-dense), time-padded.
    blocks : list of dicts with keys
        dilation, w1cat (K*Cp_in, Cp_mid) bf16, b1 (1, Cp_mid) f32,
        w2cat (K*Cp_mid, Cp_out) bf16, b2 (1, Cp_out) f32,
        wd (Cp_in, Cp_out) bf16 | None, bd (1, Cp_out) f32 | None.
    Returns (B, L_pad, Cp_last) bf16.
    """
    B, L_pad, Cp0 = x_blc.shape
    assert L_pad % tl == 0 and tl % 8 == 0
    T_tiles = L_pad // tl

    wmap = lambda b, t: (0, 0)
    cfgs = []
    in_arrays = [x_blc]
    in_specs = [pl.BlockSpec((1, tl, Cp0), lambda b, t: (b, t, 0))]
    scratch_shapes = []
    for blk in blocks:
        has_down = blk["wd"] is not None
        Cp_in = blk["w1cat"].shape[0] // ksize
        Cp_mid = blk["w1cat"].shape[1]
        H1 = (ksize - 1) * blk["dilation"]
        E = max(8, _round_up(H1, 8))              # carried halo rows
        cfgs.append(dict(dilation=blk["dilation"], E=E, has_down=has_down))

        in_arrays += [blk["w1cat"], blk["b1"], blk["w2cat"], blk["b2"]]
        in_specs += [
            pl.BlockSpec(blk["w1cat"].shape, wmap),
            pl.BlockSpec(blk["b1"].shape, wmap),
            pl.BlockSpec(blk["w2cat"].shape, wmap),
            pl.BlockSpec(blk["b2"].shape, wmap),
        ]
        if has_down:
            in_arrays += [blk["wd"], blk["bd"]]
            in_specs += [pl.BlockSpec(blk["wd"].shape, wmap),
                         pl.BlockSpec(blk["bd"].shape, wmap)]
        # Per-block causal carries (last E rows of conv1 / conv2 inputs).
        scratch_shapes += [pltpu.VMEM((E, Cp_in), jnp.bfloat16),
                           pltpu.VMEM((E, Cp_mid), jnp.bfloat16)]

    Cp_last = blocks[-1]["w2cat"].shape[1]
    kernel = _make_fused_tcn_kernel(tl, ksize, cfgs)

    # TODO(synk): if a very deep stack's resident weights exceed VMEM, split
    # the chain into groups of blocks per pallas_call.
    return pl.pallas_call(
        kernel,
        out_shape=jax.ShapeDtypeStruct((B, L_pad, Cp_last), jnp.bfloat16),
        grid=(B, T_tiles),
        in_specs=in_specs,
        out_specs=pl.BlockSpec((1, tl, Cp_last), lambda b, t: (b, t, 0)),
        scratch_shapes=scratch_shapes,
        compiler_params=pltpu.CompilerParams(
            # Batch may split across v7x's two TensorCores; time must stay
            # sequential because the causal halo is carried in VMEM scratch.
            dimension_semantics=("parallel", "arbitrary"),
            # Actual need is a few MiB (per-tile windows + weights + temps);
            # 32 MiB leaves ample headroom on v5e/v6e (128 MiB) and v7x (64).
            vmem_limit_bytes=32 * 1024 * 1024,
        ),
    )(*in_arrays)


# --------------------------------------------------------------------------
# Parameter construction (deterministic, weight_norm folded)
# --------------------------------------------------------------------------
def init_tcn_params(key, num_inputs, num_channels, kernel_size):
    """Per-block parameter dicts with effective f32 weights (PyTorch layout)."""
    params = []
    for i, out_ch in enumerate(num_channels):
        in_ch = num_inputs if i == 0 else num_channels[i - 1]
        key, k1, k2, k3, k4, k5, k6 = jax.random.split(key, 7)
        w1_oik = 0.01 * jax.random.normal(k1, (out_ch, in_ch, kernel_size), jnp.float32)
        w2_oik = 0.01 * jax.random.normal(k2, (out_ch, out_ch, kernel_size), jnp.float32)
        b1 = 0.01 * jax.random.normal(k3, (out_ch,), jnp.float32)
        b2 = 0.01 * jax.random.normal(k4, (out_ch,), jnp.float32)
        # weight_norm fold: at init g = ||v||, so the effective weight == v.
        # TODO(synk): for trained g/v checkpoints fold g * v / ||v|| here.
        if in_ch != out_ch:
            wd_oik = 0.01 * jax.random.normal(k5, (out_ch, in_ch, 1), jnp.float32)
            bd = 0.01 * jax.random.normal(k6, (out_ch,), jnp.float32)
        else:
            wd_oik, bd = None, None
        params.append(dict(dilation=2 ** i, w1_oik=w1_oik, b1=b1,
                           w2_oik=w2_oik, b2=b2, wd_oik=wd_oik, bd=bd))
    return params


def tcn_forward_pallas(x_ncw, params, kernel_size):
    """TemporalConvNet forward.  x_ncw: (B, C, L) -> (B, C_last, L) f32."""
    B, C0, L = x_ncw.shape
    K = kernel_size
    x = jnp.transpose(x_ncw, (0, 2, 1))                        # (B, L, C)

    # Time tile: multiple of 8 sublanes; larger TL amortizes per-step
    # overhead (halo recompute no longer exists thanks to the carry scheme).
    TL = min(512, _round_up(L, 8))
    L_pad = _round_up(L, TL)
    Cp0 = _round_up(C0, 128)
    x = jnp.pad(x, ((0, 0), (0, L_pad - L), (0, Cp0 - C0))).astype(jnp.bfloat16)

    blocks = []
    cin = C0
    for p in params:
        cout = p["w1_oik"].shape[0]
        Cp_in = _round_up(cin, 128)
        Cp_out = _round_up(cout, 128)

        # (O, I, K) -> (K, I, O), zero-pad channels, fold the K taps along the
        # contraction axis (im2col) so each conv is ONE (TL, K*Cp) x (K*Cp, Cp)
        # MXU matmul (K*128 = 256-deep contraction fills the v6e/v7x MXU).
        w1 = jnp.transpose(p["w1_oik"], (2, 1, 0))
        w1 = jnp.pad(w1, ((0, 0), (0, Cp_in - cin), (0, Cp_out - cout)))
        w1cat = w1.reshape(K * Cp_in, Cp_out).astype(jnp.bfloat16)
        w2 = jnp.transpose(p["w2_oik"], (2, 1, 0))
        w2 = jnp.pad(w2, ((0, 0), (0, Cp_out - cout), (0, Cp_out - cout)))
        w2cat = w2.reshape(K * Cp_out, Cp_out).astype(jnp.bfloat16)
        b1 = jnp.pad(p["b1"], (0, Cp_out - cout)).reshape(1, -1).astype(jnp.float32)
        b2 = jnp.pad(p["b2"], (0, Cp_out - cout)).reshape(1, -1).astype(jnp.float32)
        if p["wd_oik"] is not None:
            wd = jnp.transpose(p["wd_oik"][:, :, 0], (1, 0))
            wd = jnp.pad(wd, ((0, Cp_in - cin), (0, Cp_out - cout))).astype(jnp.bfloat16)
            bd = jnp.pad(p["bd"], (0, Cp_out - cout)).reshape(1, -1).astype(jnp.float32)
        else:
            wd, bd = None, None
        blocks.append(dict(dilation=p["dilation"], w1cat=w1cat, b1=b1,
                           w2cat=w2cat, b2=b2, wd=wd, bd=bd))
        cin = cout

    out = temporal_blocks_fused_pallas(x, blocks, ksize=K, tl=TL)
    out = out[:, :L, :cin].astype(jnp.float32)     # drop time/channel padding
    return jnp.transpose(out, (0, 2, 1))           # back to (B, C, L)


# --------------------------------------------------------------------------
# Pure-JAX reference (for correctness check)
# --------------------------------------------------------------------------
def _conv1d_causal_ref(x_ncw, w_oik, b, dilation, padding):
    y = jax.lax.conv_general_dilated(
        x_ncw, w_oik, window_strides=(1,), padding=[(padding, padding)],
        rhs_dilation=(dilation,), dimension_numbers=("NCH", "OIH", "NCH"))
    y = y + b[None, :, None]
    return y[:, :, : x_ncw.shape[2]]               # Chomp1d

def tcn_forward_ref(x_ncw, params, kernel_size):
    x = x_ncw.astype(jnp.float32)
    for p in params:
        d = p["dilation"]
        pad = (kernel_size - 1) * d
        h = jax.nn.relu(_conv1d_causal_ref(x, p["w1_oik"], p["b1"], d, pad))
        h = jax.nn.relu(_conv1d_causal_ref(h, p["w2_oik"], p["b2"], d, pad))
        res = x if p["wd_oik"] is None else _conv1d_causal_ref(x, p["wd_oik"], p["bd"], 1, 0)
        x = jax.nn.relu(h + res)
    return x


# --------------------------------------------------------------------------
if __name__ == "__main__":
    key = jax.random.PRNGKey(0)
    kx, kp = jax.random.split(key)

    # Small shapes consistent with the module: input (B, num_inputs, L).
    B, num_inputs, L = 2, 4, 16
    num_channels = [8, 16, 16]
    kernel_size = 2

    x = jax.random.normal(kx, (B, num_inputs, L), jnp.float32)
    params = init_tcn_params(kp, num_inputs, num_channels, kernel_size)

    out = tcn_forward_pallas(x, params, kernel_size)
    out = jax.block_until_ready(out)

    ref = tcn_forward_ref(x, params, kernel_size)
    assert out.shape == (B, num_channels[-1], L), out.shape
    err = float(jnp.max(jnp.abs(out - ref)))
    # bf16 activations / MXU operands with f32 accumulation -> loose tolerance
    assert err < 5e-3, err

    print("KERNEL_OK")
</pallas_src>

<mosaic_0001>
module attributes {stable_mosaic.version = 11 : i64} {
  func.func @kernel(%arg0: i32, %arg1: i32, %arg2: memref<1x16x128xbf16, #tpu.memory_space<vmem>>, %arg3: memref<256x128xbf16, #tpu.memory_space<vmem>>, %arg4: memref<1x128xf32, #tpu.memory_space<vmem>>, %arg5: memref<256x128xbf16, #tpu.memory_space<vmem>>, %arg6: memref<1x128xf32, #tpu.memory_space<vmem>>, %arg7: memref<128x128xbf16, #tpu.memory_space<vmem>>, %arg8: memref<1x128xf32, #tpu.memory_space<vmem>>, %arg9: memref<256x128xbf16, #tpu.memory_space<vmem>>, %arg10: memref<1x128xf32, #tpu.memory_space<vmem>>, %arg11: memref<256x128xbf16, #tpu.memory_space<vmem>>, %arg12: memref<1x128xf32, #tpu.memory_space<vmem>>, %arg13: memref<128x128xbf16, #tpu.memory_space<vmem>>, %arg14: memref<1x128xf32, #tpu.memory_space<vmem>>, %arg15: memref<256x128xbf16, #tpu.memory_space<vmem>>, %arg16: memref<1x128xf32, #tpu.memory_space<vmem>>, %arg17: memref<256x128xbf16, #tpu.memory_space<vmem>>, %arg18: memref<1x128xf32, #tpu.memory_space<vmem>>, %arg19: memref<1x16x128xbf16, #tpu.memory_space<vmem>>, %arg20: memref<8x128xbf16, #tpu.memory_space<vmem>>, %arg21: memref<8x128xbf16, #tpu.memory_space<vmem>>, %arg22: memref<8x128xbf16, #tpu.memory_space<vmem>>, %arg23: memref<8x128xbf16, #tpu.memory_space<vmem>>, %arg24: memref<8x128xbf16, #tpu.memory_space<vmem>>, %arg25: memref<8x128xbf16, #tpu.memory_space<vmem>>) attributes {dimension_semantics = [#tpu.dimension_semantics<parallel>, #tpu.dimension_semantics<arbitrary>], iteration_bounds = array<i64: 2, 1>, scalar_prefetch = 0 : i64, scratch_operands = 6 : i64, tpu.core_type = #tpu.core_type<tc>, window_params = [{transform_indices = @transform_0, window_bounds = array<i64: 1, 16, 128>}, {pipeline_mode = #tpu.pipeline_mode<synchronous>, transform_indices = @transform_1, window_bounds = array<i64: 256, 128>}, {pipeline_mode = #tpu.pipeline_mode<synchronous>, transform_indices = @transform_2, window_bounds = array<i64: 1, 128>}, {pipeline_mode = #tpu.pipeline_mode<synchronous>, transform_indices = @transform_3, window_bounds = array<i64: 256, 128>}, {pipeline_mode = #tpu.pipeline_mode<synchronous>, transform_indices = @transform_4, window_bounds = array<i64: 1, 128>}, {pipeline_mode = #tpu.pipeline_mode<synchronous>, transform_indices = @transform_5, window_bounds = array<i64: 128, 128>}, {pipeline_mode = #tpu.pipeline_mode<synchronous>, transform_indices = @transform_6, window_bounds = array<i64: 1, 128>}, {pipeline_mode = #tpu.pipeline_mode<synchronous>, transform_indices = @transform_7, window_bounds = array<i64: 256, 128>}, {pipeline_mode = #tpu.pipeline_mode<synchronous>, transform_indices = @transform_8, window_bounds = array<i64: 1, 128>}, {pipeline_mode = #tpu.pipeline_mode<synchronous>, transform_indices = @transform_9, window_bounds = array<i64: 256, 128>}, {pipeline_mode = #tpu.pipeline_mode<synchronous>, transform_indices = @transform_10, window_bounds = array<i64: 1, 128>}, {pipeline_mode = #tpu.pipeline_mode<synchronous>, transform_indices = @transform_11, window_bounds = array<i64: 128, 128>}, {pipeline_mode = #tpu.pipeline_mode<synchronous>, transform_indices = @transform_12, window_bounds = array<i64: 1, 128>}, {pipeline_mode = #tpu.pipeline_mode<synchronous>, transform_indices = @transform_13, window_bounds = array<i64: 256, 128>}, {pipeline_mode = #tpu.pipeline_mode<synchronous>, transform_indices = @transform_14, window_bounds = array<i64: 1, 128>}, {pipeline_mode = #tpu.pipeline_mode<synchronous>, transform_indices = @transform_15, window_bounds = array<i64: 256, 128>}, {pipeline_mode = #tpu.pipeline_mode<synchronous>, transform_indices = @transform_16, window_bounds = array<i64: 1, 128>}, {transform_indices = @transform_17, window_bounds = array<i64: 1, 16, 128>}]} {
    %c0_i32 = arith.constant 0 : i32
    %0 = arith.cmpi eq, %arg1, %c0_i32 : i32
    %1 = arith.extui %0 : i1 to i32
    %c0_i32_0 = arith.constant 0 : i32
    %2 = arith.cmpi ne, %1, %c0_i32_0 : i32
    scf.if %2 {
      %cst_78 = arith.constant 0.000000e+00 : bf16
      %117 = vector.broadcast %cst_78 : bf16 to vector<8x128xbf16>
      %c0_79 = arith.constant 0 : index
      %c0_80 = arith.constant 0 : index
      %118 = vector.load %arg20[%c0_79, %c0_80] : memref<8x128xbf16, #tpu.memory_space<vmem>>, vector<8x128xbf16>
      tpu.vector_store %arg20[%c0_79, %c0_80], %117 {strides = array<i32>} : memref<8x128xbf16, #tpu.memory_space<vmem>>, vector<8x128xbf16>,
      %cst_81 = arith.constant 0.000000e+00 : bf16
      %119 = vector.broadcast %cst_81 : bf16 to vector<8x128xbf16>
      %c0_82 = arith.constant 0 : index
      %c0_83 = arith.constant 0 : index
      %120 = vector.load %arg21[%c0_82, %c0_83] : memref<8x128xbf16, #tpu.memory_space<vmem>>, vector<8x128xbf16>
      tpu.vector_store %arg21[%c0_82, %c0_83], %119 {strides = array<i32>} : memref<8x128xbf16, #tpu.memory_space<vmem>>, vector<8x128xbf16>,
      %cst_84 = arith.constant 0.000000e+00 : bf16
      %121 = vector.broadcast %cst_84 : bf16 to vector<8x128xbf16>
      %c0_85 = arith.constant 0 : index
      %c0_86 = arith.constant 0 : index
      %122 = vector.load %arg22[%c0_85, %c0_86] : memref<8x128xbf16, #tpu.memory_space<vmem>>, vector<8x128xbf16>
      tpu.vector_store %arg22[%c0_85, %c0_86], %121 {strides = array<i32>} : memref<8x128xbf16, #tpu.memory_space<vmem>>, vector<8x128xbf16>,
      %cst_87 = arith.constant 0.000000e+00 : bf16
      %123 = vector.broadcast %cst_87 : bf16 to vector<8x128xbf16>
      %c0_88 = arith.constant 0 : index
      %c0_89 = arith.constant 0 : index
      %124 = vector.load %arg23[%c0_88, %c0_89] : memref<8x128xbf16, #tpu.memory_space<vmem>>, vector<8x128xbf16>
      tpu.vector_store %arg23[%c0_88, %c0_89], %123 {strides = array<i32>} : memref<8x128xbf16, #tpu.memory_space<vmem>>, vector<8x128xbf16>,
      %cst_90 = arith.constant 0.000000e+00 : bf16
      %125 = vector.broadcast %cst_90 : bf16 to vector<8x128xbf16>
      %c0_91 = arith.constant 0 : index
      %c0_92 = arith.constant 0 : index
      %126 = vector.load %arg24[%c0_91, %c0_92] : memref<8x128xbf16, #tpu.memory_space<vmem>>, vector<8x128xbf16>
      tpu.vector_store %arg24[%c0_91, %c0_92], %125 {strides = array<i32>} : memref<8x128xbf16, #tpu.memory_space<vmem>>, vector<8x128xbf16>,
      %cst_93 = arith.constant 0.000000e+00 : bf16
      %127 = vector.broadcast %cst_93 : bf16 to vector<8x128xbf16>
      %c0_94 = arith.constant 0 : index
      %c0_95 = arith.constant 0 : index
      %128 = vector.load %arg25[%c0_94, %c0_95] : memref<8x128xbf16, #tpu.memory_space<vmem>>, vector<8x128xbf16>
      tpu.vector_store %arg25[%c0_94, %c0_95], %127 {strides = array<i32>} : memref<8x128xbf16, #tpu.memory_space<vmem>>, vector<8x128xbf16>,
    } else {
    }
    %c0 = arith.constant 0 : index
    %c0_1 = arith.constant 0 : index
    %c0_2 = arith.constant 0 : index
    %3 = vector.load %arg2[%c0, %c0_1, %c0_2] : memref<1x16x128xbf16, #tpu.memory_space<vmem>>, vector<1x16x128xbf16>
    %4 = vector.shape_cast %3 : vector<1x16x128xbf16> to vector<16x128xbf16>
    %c0_3 = arith.constant 0 : index
    %c0_4 = arith.constant 0 : index
    %5 = vector.load %arg20[%c0_3, %c0_4] : memref<8x128xbf16, #tpu.memory_space<vmem>>, vector<8x128xbf16>
    %6 = tpu.concatenate %5, %4 in 0 : vector<8x128xbf16>, vector<16x128xbf16> -> vector<24x128xbf16>
    %7 = vector.extract_strided_slice %6 {offsets = [16, 0], sizes = [8, 128], strides = [1, 1]} : vector<24x128xbf16> to vector<8x128xbf16>
    %c0_5 = arith.constant 0 : index
    %c0_6 = arith.constant 0 : index
    %8 = vector.load %arg20[%c0_5, %c0_6] : memref<8x128xbf16, #tpu.memory_space<vmem>>, vector<8x128xbf16>
    tpu.vector_store %arg20[%c0_5, %c0_6], %7 {strides = array<i32>} : memref<8x128xbf16, #tpu.memory_space<vmem>>, vector<8x128xbf16>,
    %9 = vector.extract_strided_slice %6 {offsets = [7, 0], sizes = [16, 128], strides = [1, 1]} : vector<24x128xbf16> to vector<16x128xbf16>
    %10 = vector.extract_strided_slice %6 {offsets = [8, 0], sizes = [16, 128], strides = [1, 1]} : vector<24x128xbf16> to vector<16x128xbf16>
    %11 = tpu.concatenate %9, %10 in 1 : vector<16x128xbf16>, vector<16x128xbf16> -> vector<16x256xbf16>
    %c0_7 = arith.constant 0 : index
    %c0_8 = arith.constant 0 : index
    %12 = vector.load %arg3[%c0_7, %c0_8] : memref<256x128xbf16, #tpu.memory_space<vmem>>, vector<256x128xbf16>
    %cst = arith.constant dense<0.000000e+00> : vector<16x128xf32>
    %13 = tpu.matmul %11, %12, %cst {dimension_numbers = #tpu.dot_dimension_numbers<[1], [0], [0], [1], [0, 0, 1, 1], [], []>} : vector<16x256xbf16>, vector<256x128xbf16>, vector<16x128xf32> -> vector<16x128xf32>
    %c0_9 = arith.constant 0 : index
    %c0_10 = arith.constant 0 : index
    %14 = vector.load %arg4[%c0_9, %c0_10] : memref<1x128xf32, #tpu.memory_space<vmem>>, vector<1x128xf32>
    %15 = vector.broadcast %14 : vector<1x128xf32> to vector<16x128xf32>
    %16 = arith.addf %13, %15 : vector<16x128xf32>
    %cst_11 = arith.constant 0.000000e+00 : f32
    %17 = vector.broadcast %cst_11 : f32 to vector<16x128xf32>
    %18 = arith.maximumf %16, %17 : vector<16x128xf32>
    %19 = arith.truncf %18 : vector<16x128xf32> to vector<16x128xbf16>
    %c0_12 = arith.constant 0 : index
    %c0_13 = arith.constant 0 : index
    %20 = vector.load %arg21[%c0_12, %c0_13] : memref<8x128xbf16, #tpu.memory_space<vmem>>, vector<8x128xbf16>
    %21 = tpu.concatenate %20, %19 in 0 : vector<8x128xbf16>, vector<16x128xbf16> -> vector<24x128xbf16>
    %22 = vector.extract_strided_slice %21 {offsets = [16, 0], sizes = [8, 128], strides = [1, 1]} : vector<24x128xbf16> to vector<8x128xbf16>
    %c0_14 = arith.constant 0 : index
    %c0_15 = arith.constant 0 : index
    %23 = vector.load %arg21[%c0_14, %c0_15] : memref<8x128xbf16, #tpu.memory_space<vmem>>, vector<8x128xbf16>
    tpu.vector_store %arg21[%c0_14, %c0_15], %22 {strides = array<i32>} : memref<8x128xbf16, #tpu.memory_space<vmem>>, vector<8x128xbf16>,
    %24 = vector.extract_strided_slice %21 {offsets = [7, 0], sizes = [16, 128], strides = [1, 1]} : vector<24x128xbf16> to vector<16x128xbf16>
    %25 = vector.extract_strided_slice %21 {offsets = [8, 0], sizes = [16, 128], strides = [1, 1]} : vector<24x128xbf16> to vector<16x128xbf16>
    %26 = tpu.concatenate %24, %25 in 1 : vector<16x128xbf16>, vector<16x128xbf16> -> vector<16x256xbf16>
    %c0_16 = arith.constant 0 : index
    %c0_17 = arith.constant 0 : index
    %27 = vector.load %arg5[%c0_16, %c0_17] : memref<256x128xbf16, #tpu.memory_space<vmem>>, vector<256x128xbf16>
    %cst_18 = arith.constant dense<0.000000e+00> : vector<16x128xf32>
    %28 = tpu.matmul %26, %27, %cst_18 {dimension_numbers = #tpu.dot_dimension_numbers<[1], [0], [0], [1], [0, 0, 1, 1], [], []>} : vector<16x256xbf16>, vector<256x128xbf16>, vector<16x128xf32> -> vector<16x128xf32>
    %c0_19 = arith.constant 0 : index
    %c0_20 = arith.constant 0 : index
    %29 = vector.load %arg6[%c0_19, %c0_20] : memref<1x128xf32, #tpu.memory_space<vmem>>, vector<1x128xf32>
    %30 = vector.broadcast %29 : vector<1x128xf32> to vector<16x128xf32>
    %31 = arith.addf %28, %30 : vector<16x128xf32>
    %cst_21 = arith.constant 0.000000e+00 : f32
    %32 = vector.broadcast %cst_21 : f32 to vector<16x128xf32>
    %33 = arith.maximumf %31, %32 : vector<16x128xf32>
    %c0_22 = arith.constant 0 : index
    %c0_23 = arith.constant 0 : index
    %34 = vector.load %arg7[%c0_22, %c0_23] : memref<128x128xbf16, #tpu.memory_space<vmem>>, vector<128x128xbf16>
    %cst_24 = arith.constant dense<0.000000e+00> : vector<16x128xf32>
    %35 = tpu.matmul %4, %34, %cst_24 {dimension_numbers = #tpu.dot_dimension_numbers<[1], [0], [0], [1], [0, 0, 1, 1], [], []>} : vector<16x128xbf16>, vector<128x128xbf16>, vector<16x128xf32> -> vector<16x128xf32>
    %c0_25 = arith.constant 0 : index
    %c0_26 = arith.constant 0 : index
    %36 = vector.load %arg8[%c0_25, %c0_26] : memref<1x128xf32, #tpu.memory_space<vmem>>, vector<1x128xf32>
    %37 = vector.broadcast %36 : vector<1x128xf32> to vector<16x128xf32>
    %38 = arith.addf %35, %37 : vector<16x128xf32>
    %39 = arith.addf %33, %38 : vector<16x128xf32>
    %cst_27 = arith.constant 0.000000e+00 : f32
    %40 = vector.broadcast %cst_27 : f32 to vector<16x128xf32>
    %41 = arith.maximumf %39, %40 : vector<16x128xf32>
    %42 = arith.truncf %41 : vector<16x128xf32> to vector<16x128xbf16>
    %c0_28 = arith.constant 0 : index
    %c0_29 = arith.constant 0 : index
    %43 = vector.load %arg22[%c0_28, %c0_29] : memref<8x128xbf16, #tpu.memory_space<vmem>>, vector<8x128xbf16>
    %44 = tpu.concatenate %43, %42 in 0 : vector<8x128xbf16>, vector<16x128xbf16> -> vector<24x128xbf16>
    %45 = vector.extract_strided_slice %44 {offsets = [16, 0], sizes = [8, 128], strides = [1, 1]} : vector<24x128xbf16> to vector<8x128xbf16>
    %c0_30 = arith.constant 0 : index
    %c0_31 = arith.constant 0 : index
    %46 = vector.load %arg22[%c0_30, %c0_31] : memref<8x128xbf16, #tpu.memory_space<vmem>>, vector<8x128xbf16>
    tpu.vector_store %arg22[%c0_30, %c0_31], %45 {strides = array<i32>} : memref<8x128xbf16, #tpu.memory_space<vmem>>, vector<8x128xbf16>,
    %47 = vector.extract_strided_slice %44 {offsets = [6, 0], sizes = [16, 128], strides = [1, 1]} : vector<24x128xbf16> to vector<16x128xbf16>
    %48 = vector.extract_strided_slice %44 {offsets = [8, 0], sizes = [16, 128], strides = [1, 1]} : vector<24x128xbf16> to vector<16x128xbf16>
    %49 = tpu.concatenate %47, %48 in 1 : vector<16x128xbf16>, vector<16x128xbf16> -> vector<16x256xbf16>
    %c0_32 = arith.constant 0 : index
    %c0_33 = arith.constant 0 : index
    %50 = vector.load %arg9[%c0_32, %c0_33] : memref<256x128xbf16, #tpu.memory_space<vmem>>, vector<256x128xbf16>
    %cst_34 = arith.constant dense<0.000000e+00> : vector<16x128xf32>
    %51 = tpu.matmul %49, %50, %cst_34 {dimension_numbers = #tpu.dot_dimension_numbers<[1], [0], [0], [1], [0, 0, 1, 1], [], []>} : vector<16x256xbf16>, vector<256x128xbf16>, vector<16x128xf32> -> vector<16x128xf32>
    %c0_35 = arith.constant 0 : index
    %c0_36 = arith.constant 0 : index
    %52 = vector.load %arg10[%c0_35, %c0_36] : memref<1x128xf32, #tpu.memory_space<vmem>>, vector<1x128xf32>
    %53 = vector.broadcast %52 : vector<1x128xf32> to vector<16x128xf32>
    %54 = arith.addf %51, %53 : vector<16x128xf32>
    %cst_37 = arith.constant 0.000000e+00 : f32
    %55 = vector.broadcast %cst_37 : f32 to vector<16x128xf32>
    %56 = arith.maximumf %54, %55 : vector<16x128xf32>
    %57 = arith.truncf %56 : vector<16x128xf32> to vector<16x128xbf16>
    %c0_38 = arith.constant 0 : index
    %c0_39 = arith.constant 0 : index
    %58 = vector.load %arg23[%c0_38, %c0_39] : memref<8x128xbf16, #tpu.memory_space<vmem>>, vector<8x128xbf16>
    %59 = tpu.concatenate %58, %57 in 0 : vector<8x128xbf16>, vector<16x128xbf16> -> vector<24x128xbf16>
    %60 = vector.extract_strided_slice %59 {offsets = [16, 0], sizes = [8, 128], strides = [1, 1]} : vector<24x128xbf16> to vector<8x128xbf16>
    %c0_40 = arith.constant 0 : index
    %c0_41 = arith.constant 0 : index
    %61 = vector.load %arg23[%c0_40, %c0_41] : memref<8x128xbf16, #tpu.memory_space<vmem>>, vector<8x128xbf16>
    tpu.vector_store %arg23[%c0_40, %c0_41], %60 {strides = array<i32>} : memref<8x128xbf16, #tpu.memory_space<vmem>>, vector<8x128xbf16>,
    %62 = vector.extract_strided_slice %59 {offsets = [6, 0], sizes = [16, 128], strides = [1, 1]} : vector<24x128xbf16> to vector<16x128xbf16>
    %63 = vector.extract_strided_slice %59 {offsets = [8, 0], sizes = [16, 128], strides = [1, 1]} : vector<24x128xbf16> to vector<16x128xbf16>
    %64 = tpu.concatenate %62, %63 in 1 : vector<16x128xbf16>, vector<16x128xbf16> -> vector<16x256xbf16>
    %c0_42 = arith.constant 0 : index
    %c0_43 = arith.constant 0 : index
    %65 = vector.load %arg11[%c0_42, %c0_43] : memref<256x128xbf16, #tpu.memory_space<vmem>>, vector<256x128xbf16>
    %cst_44 = arith.constant dense<0.000000e+00> : vector<16x128xf32>
    %66 = tpu.matmul %64, %65, %cst_44 {dimension_numbers = #tpu.dot_dimension_numbers<[1], [0], [0], [1], [0, 0, 1, 1], [], []>} : vector<16x256xbf16>, vector<256x128xbf16>, vector<16x128xf32> -> vector<16x128xf32>
    %c0_45 = arith.constant 0 : index
    %c0_46 = arith.constant 0 : index
    %67 = vector.load %arg12[%c0_45, %c0_46] : memref<1x128xf32, #tpu.memory_space<vmem>>, vector<1x128xf32>
    %68 = vector.broadcast %67 : vector<1x128xf32> to vector<16x128xf32>
    %69 = arith.addf %66, %68 : vector<16x128xf32>
    %cst_47 = arith.constant 0.000000e+00 : f32
    %70 = vector.broadcast %cst_47 : f32 to vector<16x128xf32>
    %71 = arith.maximumf %69, %70 : vector<16x128xf32>
    %c0_48 = arith.constant 0 : index
    %c0_49 = arith.constant 0 : index
    %72 = vector.load %arg13[%c0_48, %c0_49] : memref<128x128xbf16, #tpu.memory_space<vmem>>, vector<128x128xbf16>
    %cst_50 = arith.constant dense<0.000000e+00> : vector<16x128xf32>
    %73 = tpu.matmul %42, %72, %cst_50 {dimension_numbers = #tpu.dot_dimension_numbers<[1], [0], [0], [1], [0, 0, 1, 1], [], []>} : vector<16x128xbf16>, vector<128x128xbf16>, vector<16x128xf32> -> vector<16x128xf32>
    %c0_51 = arith.constant 0 : index
    %c0_52 = arith.constant 0 : index
    %74 = vector.load %arg14[%c0_51, %c0_52] : memref<1x128xf32, #tpu.memory_space<vmem>>, vector<1x128xf32>
    %75 = vector.broadcast %74 : vector<1x128xf32> to vector<16x128xf32>
    %76 = arith.addf %73, %75 : vector<16x128xf32>
    %77 = arith.addf %71, %76 : vector<16x128xf32>
    %cst_53 = arith.constant 0.000000e+00 : f32
    %78 = vector.broadcast %cst_53 : f32 to vector<16x128xf32>
    %79 = arith.maximumf %77, %78 : vector<16x128xf32>
    %80 = arith.truncf %79 : vector<16x128xf32> to vector<16x128xbf16>
    %c0_54 = arith.constant 0 : index
    %c0_55 = arith.constant 0 : index
    %81 = vector.load %arg24[%c0_54, %c0_55] : memref<8x128xbf16, #tpu.memory_space<vmem>>, vector<8x128xbf16>
    %82 = tpu.concatenate %81, %80 in 0 : vector<8x128xbf16>, vector<16x128xbf16> -> vector<24x128xbf16>
    %83 = vector.extract_strided_slice %82 {offsets = [16, 0], sizes = [8, 128], strides = [1, 1]} : vector<24x128xbf16> to vector<8x128xbf16>
    %c0_56 = arith.constant 0 : index
    %c0_57 = arith.constant 0 : index
    %84 = vector.load %arg24[%c0_56, %c0_57] : memref<8x128xbf16, #tpu.memory_space<vmem>>, vector<8x128xbf16>
    tpu.vector_store %arg24[%c0_56, %c0_57], %83 {strides = array<i32>} : memref<8x128xbf16, #tpu.memory_space<vmem>>, vector<8x128xbf16>,
    %85 = vector.extract_strided_slice %82 {offsets = [4, 0], sizes = [16, 128], strides = [1, 1]} : vector<24x128xbf16> to vector<16x128xbf16>
    %86 = vector.extract_strided_slice %82 {offsets = [8, 0], sizes = [16, 128], strides = [1, 1]} : vector<24x128xbf16> to vector<16x128xbf16>
    %87 = tpu.concatenate %85, %86 in 1 : vector<16x128xbf16>, vector<16x128xbf16> -> vector<16x256xbf16>
    %c0_58 = arith.constant 0 : index
    %c0_59 = arith.constant 0 : index
    %88 = vector.load %arg15[%c0_58, %c0_59] : memref<256x128xbf16, #tpu.memory_space<vmem>>, vector<256x128xbf16>
    %cst_60 = arith.constant dense<0.000000e+00> : vector<16x128xf32>
    %89 = tpu.matmul %87, %88, %cst_60 {dimension_numbers = #tpu.dot_dimension_numbers<[1], [0], [0], [1], [0, 0, 1, 1], [], []>} : vector<16x256xbf16>, vector<256x128xbf16>, vector<16x128xf32> -> vector<16x128xf32>
    %c0_61 = arith.constant 0 : index
    %c0_62 = arith.constant 0 : index
    %90 = vector.load %arg16[%c0_61, %c0_62] : memref<1x128xf32, #tpu.memory_space<vmem>>, vector<1x128xf32>
    %91 = vector.broadcast %90 : vector<1x128xf32> to vector<16x128xf32>
    %92 = arith.addf %89, %91 : vector<16x128xf32>
    %cst_63 = arith.constant 0.000000e+00 : f32
    %93 = vector.broadcast %cst_63 : f32 to vector<16x128xf32>
    %94 = arith.maximumf %92, %93 : vector<16x128xf32>
    %95 = arith.truncf %94 : vector<16x128xf32> to vector<16x128xbf16>
    %c0_64 = arith.constant 0 : index
    %c0_65 = arith.constant 0 : index
    %96 = vector.load %arg25[%c0_64, %c0_65] : memref<8x128xbf16, #tpu.memory_space<vmem>>, vector<8x128xbf16>
    %97 = tpu.concatenate %96, %95 in 0 : vector<8x128xbf16>, vector<16x128xbf16> -> vector<24x128xbf16>
    %98 = vector.extract_strided_slice %97 {offsets = [16, 0], sizes = [8, 128], strides = [1, 1]} : vector<24x128xbf16> to vector<8x128xbf16>
    %c0_66 = arith.constant 0 : index
    %c0_67 = arith.constant 0 : index
    %99 = vector.load %arg25[%c0_66, %c0_67] : memref<8x128xbf16, #tpu.memory_space<vmem>>, vector<8x128xbf16>
    tpu.vector_store %arg25[%c0_66, %c0_67], %98 {strides = array<i32>} : memref<8x128xbf16, #tpu.memory_space<vmem>>, vector<8x128xbf16>,
    %100 = vector.extract_strided_slice %97 {offsets = [4, 0], sizes = [16, 128], strides = [1, 1]} : vector<24x128xbf16> to vector<16x128xbf16>
    %101 = vector.extract_strided_slice %97 {offsets = [8, 0], sizes = [16, 128], strides = [1, 1]} : vector<24x128xbf16> to vector<16x128xbf16>
    %102 = tpu.concatenate %100, %101 in 1 : vector<16x128xbf16>, vector<16x128xbf16> -> vector<16x256xbf16>
    %c0_68 = arith.constant 0 : index
    %c0_69 = arith.constant 0 : index
    %103 = vector.load %arg17[%c0_68, %c0_69] : memref<256x128xbf16, #tpu.memory_space<vmem>>, vector<256x128xbf16>
    %cst_70 = arith.constant dense<0.000000e+00> : vector<16x128xf32>
    %104 = tpu.matmul %102, %103, %cst_70 {dimension_numbers = #tpu.dot_dimension_numbers<[1], [0], [0], [1], [0, 0, 1, 1], [], []>} : vector<16x256xbf16>, vector<256x128xbf16>, vector<16x128xf32> -> vector<16x128xf32>
    %c0_71 = arith.constant 0 : index
    %c0_72 = arith.constant 0 : index
    %105 = vector.load %arg18[%c0_71, %c0_72] : memref<1x128xf32, #tpu.memory_space<vmem>>, vector<1x128xf32>
    %106 = vector.broadcast %105 : vector<1x128xf32> to vector<16x128xf32>
    %107 = arith.addf %104, %106 : vector<16x128xf32>
    %cst_73 = arith.constant 0.000000e+00 : f32
    %108 = vector.broadcast %cst_73 : f32 to vector<16x128xf32>
    %109 = arith.maximumf %107, %108 : vector<16x128xf32>
    %110 = arith.addf %109, %79 : vector<16x128xf32>
    %cst_74 = arith.constant 0.000000e+00 : f32
    %111 = vector.broadcast %cst_74 : f32 to vector<16x128xf32>
    %112 = arith.maximumf %110, %111 : vector<16x128xf32>
    %113 = arith.truncf %112 : vector<16x128xf32> to vector<16x128xbf16>
    %c0_75 = arith.constant 0 : index
    %c0_76 = arith.constant 0 : index
    %c0_77 = arith.constant 0 : index
    %114 = vector.load %arg19[%c0_75, %c0_76, %c0_77] : memref<1x16x128xbf16, #tpu.memory_space<vmem>>, vector<1x16x128xbf16>
    %115 = vector.shape_cast %114 : vector<1x16x128xbf16> to vector<16x128xbf16>
    %116 = vector.shape_cast %113 : vector<16x128xbf16> to vector<1x16x128xbf16>
    tpu.vector_store %arg19[%c0_75, %c0_76, %c0_77], %116 {strides = array<i32>} : memref<1x16x128xbf16, #tpu.memory_space<vmem>>, vector<1x16x128xbf16>,
    return
  }
  func.func @transform_0(%arg0: i32, %arg1: i32) -> (i32, i32, i32) {
    %c0_i32 = arith.constant 0 : i32
    %c0_i32_0 = arith.constant 0 : i32
    return %arg0, %arg1, %c0_i32 : i32, i32, i32
  }
  func.func @transform_1(%arg0: i32, %arg1: i32) -> (i32, i32) {
    %c0_i32 = arith.constant 0 : i32
    %c0_i32_0 = arith.constant 0 : i32
    %c0_i32_1 = arith.constant 0 : i32
    return %c0_i32, %c0_i32_0 : i32, i32
  }
  func.func @transform_2(%arg0: i32, %arg1: i32) -> (i32, i32) {
    %c0_i32 = arith.constant 0 : i32
    %c0_i32_0 = arith.constant 0 : i32
    %c0_i32_1 = arith.constant 0 : i32
    return %c0_i32, %c0_i32_0 : i32, i32
  }
  func.func @transform_3(%arg0: i32, %arg1: i32) -> (i32, i32) {
    %c0_i32 = arith.constant 0 : i32
    %c0_i32_0 = arith.constant 0 : i32
    %c0_i32_1 = arith.constant 0 : i32
    return %c0_i32, %c0_i32_0 : i32, i32
  }
  func.func @transform_4(%arg0: i32, %arg1: i32) -> (i32, i32) {
    %c0_i32 = arith.constant 0 : i32
    %c0_i32_0 = arith.constant 0 : i32
    %c0_i32_1 = arith.constant 0 : i32
    return %c0_i32, %c0_i32_0 : i32, i32
  }
  func.func @transform_5(%arg0: i32, %arg1: i32) -> (i32, i32) {
    %c0_i32 = arith.constant 0 : i32
    %c0_i32_0 = arith.constant 0 : i32
    %c0_i32_1 = arith.constant 0 : i32
    return %c0_i32, %c0_i32_0 : i32, i32
  }
  func.func @transform_6(%arg0: i32, %arg1: i32) -> (i32, i32) {
    %c0_i32 = arith.constant 0 : i32
    %c0_i32_0 = arith.constant 0 : i32
    %c0_i32_1 = arith.constant 0 : i32
    return %c0_i32, %c0_i32_0 : i32, i32
  }
  func.func @transform_7(%arg0: i32, %arg1: i32) -> (i32, i32) {
    %c0_i32 = arith.constant 0 : i32
    %c0_i32_0 = arith.constant 0 : i32
    %c0_i32_1 = arith.constant 0 : i32
    return %c0_i32, %c0_i32_0 : i32, i32
  }
  func.func @transform_8(%arg0: i32, %arg1: i32) -> (i32, i32) {
    %c0_i32 = arith.constant 0 : i32
    %c0_i32_0 = arith.constant 0 : i32
    %c0_i32_1 = arith.constant 0 : i32
    return %c0_i32, %c0_i32_0 : i32, i32
  }
  func.func @transform_9(%arg0: i32, %arg1: i32) -> (i32, i32) {
    %c0_i32 = arith.constant 0 : i32
    %c0_i32_0 = arith.constant 0 : i32
    %c0_i32_1 = arith.constant 0 : i32
    return %c0_i32, %c0_i32_0 : i32, i32
  }
  func.func @transform_10(%arg0: i32, %arg1: i32) -> (i32, i32) {
    %c0_i32 = arith.constant 0 : i32
    %c0_i32_0 = arith.constant 0 : i32
    %c0_i32_1 = arith.constant 0 : i32
    return %c0_i32, %c0_i32_0 : i32, i32
  }
  func.func @transform_11(%arg0: i32, %arg1: i32) -> (i32, i32) {
    %c0_i32 = arith.constant 0 : i32
    %c0_i32_0 = arith.constant 0 : i32
    %c0_i32_1 = arith.constant 0 : i32
    return %c0_i32, %c0_i32_0 : i32, i32
  }
  func.func @transform_12(%arg0: i32, %arg1: i32) -> (i32, i32) {
    %c0_i32 = arith.constant 0 : i32
    %c0_i32_0 = arith.constant 0 : i32
    %c0_i32_1 = arith.constant 0 : i32
    return %c0_i32, %c0_i32_0 : i32, i32
  }
  func.func @transform_13(%arg0: i32, %arg1: i32) -> (i32, i32) {
    %c0_i32 = arith.constant 0 : i32
    %c0_i32_0 = arith.constant 0 : i32
    %c0_i32_1 = arith.constant 0 : i32
    return %c0_i32, %c0_i32_0 : i32, i32
  }
  func.func @transform_14(%arg0: i32, %arg1: i32) -> (i32, i32) {
    %c0_i32 = arith.constant 0 : i32
    %c0_i32_0 = arith.constant 0 : i32
    %c0_i32_1 = arith.constant 0 : i32
    return %c0_i32, %c0_i32_0 : i32, i32
  }
  func.func @transform_15(%arg0: i32, %arg1: i32) -> (i32, i32) {
    %c0_i32 = arith.constant 0 : i32
    %c0_i32_0 = arith.constant 0 : i32
    %c0_i32_1 = arith.constant 0 : i32
    return %c0_i32, %c0_i32_0 : i32, i32
  }
  func.func @transform_16(%arg0: i32, %arg1: i32) -> (i32, i32) {
    %c0_i32 = arith.constant 0 : i32
    %c0_i32_0 = arith.constant 0 : i32
    %c0_i32_1 = arith.constant 0 : i32
    return %c0_i32, %c0_i32_0 : i32, i32
  }
  func.func @transform_17(%arg0: i32, %arg1: i32) -> (i32, i32, i32) {
    %c0_i32 = arith.constant 0 : i32
    %c0_i32_0 = arith.constant 0 : i32
    return %arg0, %arg1, %c0_i32 : i32, i32, i32
  }
}

</mosaic_0001>

<bundles_post_ra>
// kernel: tpu_custom_call.1
= control target key start
LH: loop header
LB: loop body
LE: loop exit
PB: predicated region body
PF: predicated region fallthrough
CT: control target
= control target key end

     0   :  { %s3981_s0 = inlined_call_operand.hbm [shape: bf16[2,16,128], index: 0, kind: input, shape index: {}]   ;;  %s3982_s1 = inlined_call_operand.hbm [shape: bf16[256,128], index: 1, kind: input, shape index: {}]   ;;  %s3983_s2 = inlined_call_operand.vmem [shape: f32[1,128], index: 2, kind: input, shape index: {}]   ;;  %s3984_s3 = inlined_call_operand.hbm [shape: bf16[256,128], index: 3, kind: input, shape index: {}]   ;;  %s3985_s4 = inlined_call_operand.vmem [shape: f32[1,128], index: 4, kind: input, shape index: {}]   ;;  %s3986_s5 = inlined_call_operand.hbm [shape: bf16[128,128], index: 5, kind: input, shape index: {}]   ;;  %s3987_s6 = inlined_call_operand.vmem [shape: f32[1,128], index: 6, kind: input, shape index: {}]   ;;  %s3988_s7 = inlined_call_operand.hbm [shape: bf16[256,128], index: 7, kind: input, shape index: {}]   ;;  %s3989_s8 = inlined_call_operand.vmem [shape: f32[1,128], index: 8, kind: input, shape index: {}]   ;;  %s3990_s9 = inlined_call_operand.hbm [shape: bf16[256,128], index: 9, kind: input, shape index: {}]   ;;  %s3991_s10 = inlined_call_operand.vmem [shape: f32[1,128], index: 10, kind: input, shape index: {}]   ;;  %s3992_s11 = inlined_call_operand.hbm [shape: bf16[128,128], index: 11, kind: input, shape index: {}]   ;;  %s3993_s12 = inlined_call_operand.vmem [shape: f32[1,128], index: 12, kind: input, shape index: {}]   ;;  %s3994_s13 = inlined_call_operand.hbm [shape: bf16[256,128], index: 13, kind: input, shape index: {}]   ;;  %s3995_s14 = inlined_call_operand.vmem [shape: f32[1,128], index: 14, kind: input, shape index: {}]   ;;  %s3996_s15 = inlined_call_operand.hbm [shape: bf16[256,128], index: 15, kind: input, shape index: {}]   ;;  %s3997_s16 = inlined_call_operand.vmem [shape: f32[1,128], index: 16, kind: input, shape index: {}]   ;;  %s3998_s17 = inlined_call_operand.hbm [shape: bf16[2,16,128], index: 17, kind: output, shape index: {}]  }
   0x1   :  { %4009 = sst [smem:[#allocation31_spill]] %s3981_s0 }
   0x2   :  { %4010 = sst [smem:[#allocation32_spill]] %s3982_s1 }
   0x3   :  { %4011 = sst [smem:[#allocation33_spill]] %s3983_s2 }
   0x4   :  { %4012 = sst [smem:[#allocation34_spill]] %s3985_s4 }
   0x5   :  { %4013 = sst [smem:[#allocation35_spill]] %s3986_s5 }
   0x6   :  { %4014 = sst [smem:[#allocation36_spill]] %s3987_s6 }
   0x7   :  { %4015 = sst [smem:[#allocation37_spill]] %s3989_s8 }
   0x8   :  { %4016 = sst [smem:[#allocation38_spill]] %s3991_s10 }
   0x9   :  { %4017 = sst [smem:[#allocation39_spill]] %s3993_s12 }
   0xa   :  { %4018 = sst [smem:[#allocation40_spill]] %s3995_s14 }
   0xb   :  { %4019 = sst [smem:[#allocation41_spill]] %s3997_s16 }
   0xc   :  { %4020 = sst [smem:[#allocation42_spill]] %s3998_s17 }
   0xd   :  { %22 = vsyncpa [#allocation9], 0 }
   0xe   :  { %24 = vsyncpa [#allocation9 + $0x1], 0 }
   0xf   :  { %25 = vsyncpa [#allocation12], 0 }
  0x10   :  { %26 = vsyncpa [#allocation15], 0 }
  0x11   :  { %27 = vsyncpa [#allocation18], 0 }
  0x12   :  { %28 = vsyncpa [#allocation21], 0 }
  0x13   :  { %29 = vsyncpa [#allocation10], 0 }
  0x14   :  { %31 = vsyncpa [#allocation10 + $0x1], 0  ;;  %s3476_s24 = smov 0   ;;  %s3478_s25 = smov 0  }
  0x15   :  { %s3480_s26 = smov 0   ;;  %s3482_s27 = smov 0  }
  0x16   :  { %s3484_s28 = smov 0   ;;  %s3486_s29 = smov 0  }
  0x17 LB: > { %4021 = sst [smem:[#allocation30_spill]] %s3359_s27  ;;  %s4001_s0 = sadd.s32 4294967295, %s3367_s29   ;;  %s3367_s29 = sphi %s3486_s29, %s37_s29   ;;  %s3363_s28 = sphi %s3484_s28, %s4057_s28   ;;  %s3359_s27 = sphi %s3482_s27, %s4056_s27   ;;  %s3355_s26 = sphi %s3480_s26, %s4055_s26   ;;  %s3351_s25 = sphi %s3478_s25, %s4054_s25   ;;  %s3347_s24 = sphi %s3476_s24, %s4053_s24  }
  0x18   : > { %p2397_p0 = scmp.ge.s32.totalorder %s3367_s29, 1  ;;  %p3510_p1 = scmp.eq.s32.totalorder %s4001_s0, 0 }
  0x19   : > { %p446_p2 = scmp.lt.s32.totalorder %s3367_s29, 3  ;;  %s3369_s19 = smov [#allocation11]  }
  0x1a   : > { %s4022_s30 = scalar_select %p3510_p1, 1, 0 }
  0x1b   : > { %p3515_p3 = pnand %p2397_p0, %p446_p2  ;;  %s458_s1 = sshll.u32 %s3369_s19, 4  ;;  %s3519_s1 = int_to_ptr.vmem [resolvable:$true] %s458_s1 }
  0x1c   : > { %s3370_s21 = smov [#allocation14]   ;;  %s3371_s23 = smov [#allocation17]  }
  0x1d   : > { %s4023_s18 = scalar_select %p3515_p3, 1, 0 }
  0x1e   : > { %p2786_p4 = pneg %p3515_p3  ;;  %s490_s22 = sshll.u32 %s3370_s21, 4  ;;  %s3530_s22 = int_to_ptr.vmem [resolvable:$true] %s490_s22 }
  0x1f   : > { %s3532_s0 = sshll.u32 %s3371_s23, 4  ;;  %s4025_s16 = sld [smem:[#allocation32_spill]]  ;;  %s523_s0 = int_to_ptr.vmem [resolvable:$true] %s3532_s0 }
  0x20   : > { %p3526_p6 = pnand %p2786_p4, %p3510_p1 }
  0x22   : > { %p3542_p8 = pneg %p3526_p6 }
  0x25   : > { %s3015_s27 = scalar_lea.hbm %s4025_s16, 2048 }
  0x26   : > { %p3016_p7 = scmp.ne.s32.totalorder %s4025_s16, %s3015_s27  ;;  %p3022_p11 = scmp.lt.u32.totalorder %s3015_s27, %s4025_s16 }
  0x28   : > { %p3018_p9 = pnand %p3542_p8, %p3016_p7 }
  0x2a   : > { %p3019_p10 = pneg %p3018_p9 }
  0x2c   : > { %p3024_p12 = pnand %p3022_p11, %p3019_p10 }
  0x2e   : > { %3027 = shalt.err (!%p3024_p12)
}
  0x2f   : > { %s3028_s12 = scalar_lea.vmem %s3519_s1, 2048  ;;  %p3036_p4 = scmp.lt.s32.totalorder %s3519_s1, %s3519_s1 }
  0x30   : > { %p3029_p13 = scmp.ne.s32.totalorder %s3519_s1, %s3028_s12  ;;  %p3037_p5 = scmp.lt.s32.totalorder %s3028_s12, %s3028_s12 }
  0x32   : > { %p3031_p0 = pnand %p3029_p13, %p3542_p8  ;;  %p3038_p7 = por %p3037_p5, %p3036_p4 }
  0x34   : > { %p3032_p2 = pneg %p3031_p0 }
  0x36   : > { %p3039_p9 = pnand %p3038_p7, %p3032_p2 }
  0x38   : > { %3042 = shalt.err (!%p3039_p9)
}
  0x39   : > { %s4006_s14 = smov 64   ;;  %s4007_s17 = smov 4  }
  0x3a   : > { %2789 = dma.hbm_to_vmem [thread:$0]  (!%p3526_p6), %s4025_s16, 2048, %s3519_s1, [#allocation12], %s4006_s14, %s4006_s14, %s4007_s17  }
  0x3b   : > { %s4027_s5 = sld [smem:[#allocation35_spill]] }
  0x41   : > { %s3043_s12 = scalar_lea.hbm %s4027_s5, 1024 }
  0x42   : > { %p3044_p5 = scmp.ne.s32.totalorder %s4027_s5, %s3043_s12  ;;  %p3050_p12 = scmp.lt.u32.totalorder %s3043_s12, %s4027_s5 }
  0x44   : > { %p3046_p10 = pnand %p3044_p5, %p3542_p8 }
  0x46   : > { %p3047_p11 = pneg %p3046_p10 }
  0x48   : > { %p3052_p13 = pnand %p3050_p12, %p3047_p11 }
  0x4a   : > { %3055 = shalt.err (!%p3052_p13)
}
  0x4b   : > { %s3056_s1 = scalar_lea.vmem %s3530_s22, 1024  ;;  %p3064_p7 = scmp.lt.s32.totalorder %s3530_s22, %s3530_s22 }
  0x4c   : > { %p3057_p0 = scmp.ne.s32.totalorder %s3530_s22, %s3056_s1  ;;  %p3065_p9 = scmp.lt.s32.totalorder %s3056_s1, %s3056_s1 }
  0x4e   : > { %p3059_p2 = pnand %p3057_p0, %p3542_p8  ;;  %p3066_p5 = por %p3065_p9, %p3064_p7 }
  0x50   : > { %p3060_p4 = pneg %p3059_p2 }
  0x52   : > { %p3067_p10 = pnand %p3066_p5, %p3060_p4 }
  0x54   : > { %3070 = shalt.err (!%p3067_p10)
}
  0x55   : > { %2795 = dma.hbm_to_vmem [thread:$0]  (!%p3526_p6), %s4027_s5, 1024, %s3530_s22, [#allocation15], %s4006_s14, %s4006_s14, %s4007_s17  }
  0x56   : > { %s3071_s27 = scalar_lea.hbm %s3990_s9, 2048 }
  0x57   : > { %p3072_p11 = scmp.ne.s32.totalorder %s3990_s9, %s3071_s27  ;;  %p3078_p0 = scmp.lt.u32.totalorder %s3071_s27, %s3990_s9 }
  0x59   : > { %p3074_p12 = pnand %p3072_p11, %p3542_p8 }
  0x5b   : > { %p3075_p13 = pneg %p3074_p12 }
  0x5d   : > { %p3080_p2 = pnand %p3078_p0, %p3075_p13 }
  0x5f   : > { %3083 = shalt.err (!%p3080_p2)
}
  0x60   : > { %s3084_s1 = scalar_lea.vmem %s523_s0, 2048  ;;  %p3092_p5 = scmp.lt.s32.totalorder %s523_s0, %s523_s0 }
  0x61   : > { %p3085_p4 = scmp.ne.s32.totalorder %s523_s0, %s3084_s1  ;;  %p3093_p10 = scmp.lt.s32.totalorder %s3084_s1, %s3084_s1 }
  0x63   : > { %p3087_p7 = pnand %p3085_p4, %p3542_p8  ;;  %p3094_p3 = por %p3093_p10, %p3092_p5 }
  0x65   : > { %p3088_p9 = pneg %p3087_p7 }
  0x67   : > { %p3095_p1 = pnand %p3094_p3, %p3088_p9 }
  0x69   : > { %3098 = shalt.err (!%p3095_p1)
}
  0x6a   : > { %2801 = dma.hbm_to_vmem [thread:$0]  (!%p3526_p6), %s3990_s9, 2048, %s523_s0, [#allocation18], %s4006_s14, %s4006_s14, %s4007_s17  }
  0x6b   : > { %s3374_s4 = smov [#allocation20]   ;;  %s3375_s8 = smov [#allocation13]  }
  0x6c   : > { %s554_s6 = sshll.u32 %s3374_s4, 4  ;;  %s474_s27 = sshll.u32 %s3375_s8, 4  ;;  %s555_s6 = int_to_ptr.vmem [resolvable:$true] %s554_s6  ;;  %s475_s27 = int_to_ptr.vmem [resolvable:$true] %s474_s27 }
  0x6d   : > { %s3099_s23 = scalar_lea.hbm %s3994_s13, 2048 }
  0x6e   : > { %p3100_p1 = scmp.ne.s32.totalorder %s3994_s13, %s3099_s23  ;;  %p3106_p12 = scmp.lt.u32.totalorder %s3099_s23, %s3994_s13 }
  0x70   : > { %p3102_p3 = pnand %p3100_p1, %p3542_p8 }
  0x72   : > { %p3103_p11 = pneg %p3102_p3 }
  0x74   : > { %p3108_p13 = pnand %p3106_p12, %p3103_p11 }
  0x76   : > { %3111 = shalt.err (!%p3108_p13)
}
  0x77   : > { %s3112_s0 = scalar_lea.vmem %s555_s6, 2048  ;;  %p3120_p7 = scmp.lt.s32.totalorder %s555_s6, %s555_s6 }
  0x78   : > { %p3113_p0 = scmp.ne.s32.totalorder %s555_s6, %s3112_s0  ;;  %p3121_p9 = scmp.lt.s32.totalorder %s3112_s0, %s3112_s0 }
  0x7a   : > { %p3115_p2 = pnand %p3113_p0, %p3542_p8  ;;  %p3122_p5 = por %p3121_p9, %p3120_p7 }
  0x7c   : > { %p3116_p4 = pneg %p3115_p2 }
  0x7e   : > { %p3123_p10 = pnand %p3122_p5, %p3116_p4 }
  0x80   : > { %3126 = shalt.err (!%p3123_p10)
}
  0x81   : > { %2807 = dma.hbm_to_vmem [thread:$0]  (!%p3526_p6), %s3994_s13, 2048, %s555_s6, [#allocation21], %s4006_s14, %s4006_s14, %s4007_s17  }
  0x82   : > { %s3127_s19 = scalar_lea.hbm %s3984_s3, 2048 }
  0x83   : > { %p3128_p1 = scmp.ne.s32.totalorder %s3984_s3, %s3127_s19  ;;  %p3134_p12 = scmp.lt.u32.totalorder %s3127_s19, %s3984_s3 }
  0x85   : > { %p3130_p3 = pnand %p3128_p1, %p3542_p8 }
  0x87   : > { %p3131_p11 = pneg %p3130_p3 }
  0x89   : > { %p3136_p13 = pnand %p3134_p12, %p3131_p11 }
  0x8b   : > { %3139 = shalt.err (!%p3136_p13)
}
  0x8c   : > { %s3140_s22 = scalar_lea.vmem %s475_s27, 2048  ;;  %p3148_p7 = scmp.lt.s32.totalorder %s475_s27, %s475_s27 }
  0x8d   : > { %p3141_p0 = scmp.ne.s32.totalorder %s475_s27, %s3140_s22  ;;  %p3149_p9 = scmp.lt.s32.totalorder %s3140_s22, %s3140_s22 }
  0x8f   : > { %p3143_p2 = pnand %p3141_p0, %p3542_p8  ;;  %p3150_p5 = por %p3149_p9, %p3148_p7 }
  0x91   : > { %p3144_p4 = pneg %p3143_p2 }
  0x93   : > { %p3151_p10 = pnand %p3150_p5, %p3144_p4 }
  0x95   : > { %3154 = shalt.err (!%p3151_p10)
}
  0x96   : > { %2792 = dma.hbm_to_vmem [thread:$0]  (!%p3526_p6), %s3984_s3, 2048, %s475_s27, [#allocation12], %s4006_s14, %s4006_s14, %s4007_s17  }
  0x97   : > { %s3376_s5 = smov [#allocation16]   ;;  %s3377_s4 = smov [#allocation19]  }
  0x98   : > { %s506_s2 = sshll.u32 %s3376_s5, 4  ;;  %s538_s8 = sshll.u32 %s3377_s4, 4  ;;  %s507_s2 = int_to_ptr.vmem [resolvable:$true] %s506_s2  ;;  %s539_s8 = int_to_ptr.vmem [resolvable:$true] %s538_s8 }
  0x99   : > { %s3155_s23 = scalar_lea.hbm %s3988_s7, 2048 }
  0x9a   : > { %p3156_p1 = scmp.ne.s32.totalorder %s3988_s7, %s3155_s23  ;;  %p3162_p12 = scmp.lt.u32.totalorder %s3155_s23, %s3988_s7 }
  0x9c   : > { %p3158_p3 = pnand %p3156_p1, %p3542_p8 }
  0x9e   : > { %p3159_p11 = pneg %p3158_p3 }
  0xa0   : > { %p3164_p13 = pnand %p3162_p12, %p3159_p11 }
  0xa2   : > { %3167 = shalt.err (!%p3164_p13)
}
  0xa3   : > { %s3168_s27 = scalar_lea.vmem %s507_s2, 2048  ;;  %p3176_p7 = scmp.lt.s32.totalorder %s507_s2, %s507_s2 }
  0xa4   : > { %p3169_p0 = scmp.ne.s32.totalorder %s507_s2, %s3168_s27  ;;  %p3177_p9 = scmp.lt.s32.totalorder %s3168_s27, %s3168_s27 }
  0xa6   : > { %p3171_p2 = pnand %p3169_p0, %p3542_p8  ;;  %p3178_p5 = por %p3177_p9, %p3176_p7 }
  0xa8   : > { %p3172_p4 = pneg %p3171_p2 }
  0xaa   : > { %p3179_p10 = pnand %p3178_p5, %p3172_p4 }
  0xac   : > { %3182 = shalt.err (!%p3179_p10)
}
  0xad   : > { %2798 = dma.hbm_to_vmem [thread:$0]  (!%p3526_p6), %s3988_s7, 2048, %s507_s2, [#allocation15], %s4006_s14, %s4006_s14, %s4007_s17  }
  0xae   : > { %s3183_s21 = scalar_lea.hbm %s3992_s11, 1024 }
  0xaf   : > { %p3184_p1 = scmp.ne.s32.totalorder %s3992_s11, %s3183_s21  ;;  %p3190_p12 = scmp.lt.u32.totalorder %s3183_s21, %s3992_s11 }
  0xb1   : > { %p3186_p3 = pnand %p3184_p1, %p3542_p8 }
  0xb3   : > { %p3187_p11 = pneg %p3186_p3 }
  0xb5   : > { %p3192_p13 = pnand %p3190_p12, %p3187_p11 }
  0xb7   : > { %3195 = shalt.err (!%p3192_p13)
}
  0xb8   : > { %s3196_s6 = scalar_lea.vmem %s539_s8, 1024  ;;  %p3204_p7 = scmp.lt.s32.totalorder %s539_s8, %s539_s8 }
  0xb9   : > { %p3197_p0 = scmp.ne.s32.totalorder %s539_s8, %s3196_s6  ;;  %p3205_p9 = scmp.lt.s32.totalorder %s3196_s6, %s3196_s6 }
  0xbb   : > { %p3199_p2 = pnand %p3197_p0, %p3542_p8  ;;  %p3206_p5 = por %p3205_p9, %p3204_p7 }
  0xbd   : > { %p3200_p4 = pneg %p3199_p2 }
  0xbf   : > { %p3207_p10 = pnand %p3206_p5, %p3200_p4 }
  0xc1   : > { %3210 = shalt.err (!%p3207_p10)
}
  0xc2   : > { %2804 = dma.hbm_to_vmem [thread:$0]  (!%p3526_p6), %s3992_s11, 1024, %s539_s8, [#allocation18], %s4006_s14, %s4006_s14, %s4007_s17  }
  0xc3   : > { %s3378_s0 = smov [#allocation22]   ;;  %s3211_s21 = scalar_lea.hbm %s3996_s15, 2048 }
  0xc4   : > { %s570_s5 = sshll.u32 %s3378_s0, 4  ;;  %p3212_p1 = scmp.ne.s32.totalorder %s3996_s15, %s3211_s21  ;;  %s571_s5 = int_to_ptr.vmem [resolvable:$true] %s570_s5 }
  0xc5   : > { %p3218_p12 = scmp.lt.u32.totalorder %s3211_s21, %s3996_s15 }
  0xc6   : > { %p3214_p3 = pnand %p3212_p1, %p3542_p8 }
  0xc8   : > { %p3215_p11 = pneg %p3214_p3 }
  0xca   : > { %p3220_p13 = pnand %p3218_p12, %p3215_p11 }
  0xcc   : > { %3223 = shalt.err (!%p3220_p13)
}
  0xcd   : > { %s3224_s8 = scalar_lea.vmem %s571_s5, 2048  ;;  %p3232_p7 = scmp.lt.s32.totalorder %s571_s5, %s571_s5 }
  0xce   : > { %p3225_p0 = scmp.ne.s32.totalorder %s571_s5, %s3224_s8  ;;  %p3233_p9 = scmp.lt.s32.totalorder %s3224_s8, %s3224_s8 }
  0xd0   : > { %p3227_p2 = pnand %p3225_p0, %p3542_p8  ;;  %p3234_p5 = por %p3233_p9, %p3232_p7 }
  0xd2   : > { %p3228_p4 = pneg %p3227_p2 }
  0xd4   : > { %p3235_p10 = pnand %p3234_p5, %p3228_p4 }
  0xd6   : > { %3238 = shalt.err (!%p3235_p10)
}
  0xd7   : > { %2810 = dma.hbm_to_vmem [thread:$0]  (!%p3526_p6), %s3996_s15, 2048, %s571_s5, [#allocation21], %s4006_s14, %s4006_s14, %s4007_s17  }
  0xd8   : > { %s2396_s10 = sadd.s32 4294967294, %s3367_s29   ;;  %s49_s20 = sadd.s32 1, %s3363_s28 }
  0xd9   : > { %p51_p8 = scmp.ge.s32.totalorder %s49_s20, 2  ;;  %s58_s27 = sadd.s32 1, %s3355_s26 }
  0xda   : > { %p65_p1 = scmp.ne.s32.totalorder %s3355_s26, %s3351_s25  ;;  %p66_p3 = scmp.eq.s32.totalorder %s3367_s29, 0 }
  0xdb   : > { %s4059_s20 = smov (%p51_p8, %s49_s20), 0  ;;  %p71_p12 = scmp.ne.s32.totalorder %s3351_s25, %s3347_s24 }
  0xdc   : > { %p3727_p11 = por %p66_p3, %p65_p1  ;;  %s53_s5 = ssub.s32 %s3363_s28, %s4059_s20 }
  0xdd   : > { %s4029_s4 = sadd.s32 4294967295, %s3367_s29   ;;  %p56_p13 = scmp.eq.s32.totalorder %s53_s5, 0 }
  0xde   : > { %p433_p6 = scmp.eq.s32.totalorder %s4029_s4, 1  ;;  %p4030_p0 = scmp.ne.s32.totalorder %s4022_s30, 0 }
  0xdf   : > { %p439_p7 = scmp.eq.s32.totalorder %s2396_s10, 1  ;;  %p2827_p5 = scmp.lt.s32.totalorder %s3367_s29, 2 }
  0xe0   : > { %p3739_p2 = por %p4030_p0, %p71_p12  ;;  %p3743_p4 = por %p433_p6, %p65_p1 }
  0xe1   : > { %s3748_s23 = scalar_select %p56_p13, %s3355_s26, %s58_s27  }
  0xe2   : > { %s4032_s21 = scalar_select %p3743_p4, 1, 0 }
  0xe3   : > { %p3750_p9 = por %p439_p7, %p71_p12  ;;  %s587_s1 = sand.u32 1, %s3355_s26  }
  0xe4   : > { %s2551_s22 = sshll.u32 %s3363_s28, 7  ;;  %s2407_s8 = sshll.u32 %s587_s1, 3 }
  0xe5   : > { %s4033_s12 = scalar_select %p3750_p9, 1, 0 }
  0xe6   : > { %s4034_s5 = sld [smem:[#allocation31_spill]]  ;;  %s591_s10 = scalar_lea.vmem [#allocation8], %s2407_s8 }
  0xe7   : > { %s600_s27 = sshll.u32 %s591_s10, 4  ;;  %p3764_p10 = pnand %p2827_p5, %p3727_p11  ;;  %s3768_s27 = int_to_ptr.vmem [resolvable:$true] %s600_s27 }
  0xe8   : > { %s3770_s17 = scalar_lea.sflag [#allocation9], %s587_s1 }
  0xe9   : > { %p3241_p1 = pneg %p3764_p10 }
  0xec   : > { %s3760_s4 = scalar_lea.hbm %s4034_s5, %s2551_s22  ;;  %s3244_s8 = scalar_lea.hbm %s4034_s5, 256 }
  0xed   : > { %s3239_s6 = scalar_lea.hbm %s3760_s4, 128  ;;  %p3245_p11 = scmp.lt.u32.totalorder %s3760_s4, %s4034_s5 }
  0xee   : > { %p3240_p8 = scmp.ne.s32.totalorder %s3760_s4, %s3239_s6  ;;  %p3246_p6 = scmp.lt.u32.totalorder %s3244_s8, %s3239_s6 }
  0xef   : > { %p3248_p0 = scmp.lt.u32.totalorder %s3239_s6, %s3760_s4 }
  0xf0   : > { %p3242_p3 = pnand %p3241_p1, %p3240_p8  ;;  %p3247_p13 = por %p3246_p6, %p3245_p11 }
  0xf2   : > { %p3243_p12 = pneg %p3242_p3  ;;  %p3249_p7 = por %p3248_p0, %p3247_p13 }
  0xf4   : > { %p3250_p5 = pnand %p3249_p7, %p3243_p12 }
  0xf6   : > { %3253 = shalt.err (!%p3250_p5)
}
  0xf7   : > { %s3254_s1 = scalar_lea.vmem %s3768_s27, 128  ;;  %s3379_s22 = smov [#allocation8]  }
  0xf8   : > { %p3255_p8 = scmp.ne.s32.totalorder %s3768_s27, %s3254_s1  ;;  %s3259_s0 = sshll.u32 %s3379_s22, 4  ;;  %s3260_s0 = int_to_ptr.vmem [resolvable:$false] %s3259_s0 }
  0xf9   : > { %s3261_s2 = scalar_lea.vmem %s3260_s0, 256  ;;  %p3262_p4 = scmp.lt.s32.totalorder %s3768_s27, %s3260_s0 }
  0xfa   : > { %p3257_p3 = pnand %p3255_p8, %p3241_p1  ;;  %p3263_p11 = scmp.lt.s32.totalorder %s3261_s2, %s3254_s1 }
  0xfc   : > { %p3258_p9 = pneg %p3257_p3  ;;  %p3264_p6 = por %p3263_p11, %p3262_p4 }
  0xfe   : > { %p3265_p13 = pnand %p3264_p6, %p3258_p9 }
 0x100   : > { %3268 = shalt.err (!%p3265_p13)
}
 0x101   : > { %s4036_s6 = smov 4   ;;  %s4037_s8 = smov 64  }
 0x102   : > { %2814 = dma.hbm_to_vmem [thread:$0]  (!%p3764_p10), %s3760_s4, 128, %s3768_s27, %s3770_s17, %s4037_s8, %s4037_s8, %s4036_s6  }
 0x103   : > { %p4038_p1 = scmp.ne.s32.totalorder %s4023_s18, 0 }
 0x104   : > { %s3804_s10 = sand.u32 (!%p4038_p1), 1, %s3351_s25  }
 0x105   : > { %612 = sbr.rel (%p4038_p1) target bundleno = 1734 (0x6c6), region = 88  ;;  %s2411_s1 = sshll.u32 (!%p4038_p1), %s3804_s10, 3 }
 0x106   : > { %s615_s22 = scalar_lea.sflag (!%p4038_p1), [#allocation9], %s3804_s10  ;;  %s3810_s14 = scalar_lea.vmem (!%p4038_p1), [#allocation8], %s2411_s1 }
 0x10c   : > { %3322 = dma.done.wait (%p3739_p2), %s615_s22, 128  }
 0x10d   : > { %3324 = vsyncadd (%p3739_p2), %s615_s22, 4294967168  ;;  %p4039_p4 = scmp.ne.s32.totalorder %s4022_s30, 0 }
 0x10f   : > { %3326 = dma.done.wait (%p4039_p4), [#allocation12], 4096  }
 0x110   : > { %3328 = vsyncadd (%p4039_p4), [#allocation12], 4294963200 }
 0x111   : > { %3330 = dma.done.wait (%p4039_p4), [#allocation15], 3072  }
 0x112   : > { %3332 = vsyncadd (%p4039_p4), [#allocation15], 4294964224 }
 0x113   : > { %3334 = dma.done.wait (%p4039_p4), [#allocation18], 3072  }
 0x114   : > { %3336 = vsyncadd (%p4039_p4), [#allocation18], 4294964224 }
 0x115   : > { %3338 = dma.done.wait (%p4039_p4), [#allocation21], 4096  }
 0x116   : > { %3340 = vsyncadd (%p4039_p4), [#allocation21], 4294963200  ;;  %v3380_v0 = vmov 0   ;;  %v2900_v1 = vld [vmem:[#allocation11 + $0x40] sm:$0xff]   ;;  %v2902_v3 = vld [vmem:[#allocation11 + $0x48] sm:$0xff]   ;;  %vm724_vm0 = vcmask 1043456  }
 0x117   : > { %708 = vst [vmem:[#allocation2] sm:$0xf] %v3380_v0  ;;  %709 = vst [vmem:[#allocation3] sm:$0xf] %v3380_v0  ;;  %v2901_v2 = vld [vmem:[#allocation11] sm:$0xff]   ;;  %2560 = vmatprep.subr.bf16.mxu0 %v2900_v1  ;;  %v2903_v4 = vld [vmem:[#allocation11 + $0x8] sm:$0xff]  }
 0x118   : > { %710 = vst [vmem:[#allocation4] sm:$0xf] %v3380_v0  ;;  %711 = vst [vmem:[#allocation5] sm:$0xf] %v3380_v0  ;;  %2561 = vmatpush3.bf16.msra.mxu0 %v2901_v2  ;;  %v2904_v5 = vld [vmem:[#allocation11 + $0x50] sm:$0xff]   ;;  %v2906_v7 = vld [vmem:[#allocation11 + $0x58] sm:$0xff]  }
 0x119   : > { %712 = vst [vmem:[#allocation6] sm:$0xf] %v3380_v0  ;;  %713 = vst [vmem:[#allocation7] sm:$0xf] %v3380_v0  ;;  %2562 = vmatprep.subr.bf16.mxu0 %v2902_v3  ;;  %v2905_v6 = vld [vmem:[#allocation11 + $0x10] sm:$0xff]   ;;  %v2907_v8 = vld [vmem:[#allocation11 + $0x18] sm:$0xff]  }
 0x11a   : > { %v2908_v9 = vld [vmem:[#allocation11 + $0x60] sm:$0xff]   ;;  %v2910_v11 = vld [vmem:[#allocation11 + $0x68] sm:$0xff]   ;;  %vm729_vm1 = vsmask.f32 7424  ;;  %v3833_v12 = vld [vmem:[%s3810_s14] sm:$0xf] }
 0x11b   : > { %v2909_v10 = vld [vmem:[#allocation11 + $0x20] sm:$0xff]   ;;  %v3836_v13 = vld [vmem:[%s3810_s14 + $0x4] sm:$0xf]  ;;  %v2911_v15 = vld [vmem:[#allocation11 + $0x28] sm:$0xff]   ;;  %v2421_v16 = vcombine.low %v3833_v12, %v3833_v12  ;;  %vm783_vm2 = vsmask.f32 4352 }
 0x11c   : > { %2563 = vmatpush3.bf16.msra.mxu0 %v2903_v4  ;;  %v2422_v17 = vcombine.low %v3836_v13, %v3836_v13  ;;  %v2918_v18 = vld [vmem:[#allocation13 + $0x40] sm:$0xff]   ;;  %v2912_v19 = vld [vmem:[#allocation11 + $0x70] sm:$0xff]   ;;  %v2914_v29 = vld [vmem:[#allocation11 + $0x78] sm:$0xff]   ;;  %v3381_v53 = vmov 0.0   ;;  %vm3382_vm3 = vmmov 0   ;;  %s4040_s17 = sld [smem:[#allocation33_spill]] }
 0x11d   : > { %2564 = vmatprep.subr.bf16.mxu0 %v2904_v5  ;;  %v2919_v20 = vld [vmem:[#allocation13] sm:$0xff]   ;;  %2582 = vmatprep.subr.bf16.mxu1 %v2918_v18  ;;  %v2913_v26 = vld [vmem:[#allocation11 + $0x30] sm:$0xff]   ;;  %v2915_v36 = vld [vmem:[#allocation11 + $0x38] sm:$0xff]   ;;  %s4041_s27 = sld [smem:[#allocation34_spill]]  ;;  %s4042_s6 = sld [smem:[#allocation36_spill]]  ;;  %vm1303_vm4 = vcmask 1046528  }
 0x11e   : > { %v716_v14 = vld [vmem:[#allocation2] sm:$0xf]  ;;  %v737_v22 = vshll.u32 %v2422_v17, 16  ;;  %v741_v23 = vshrl.u32 %v2422_v17, 16  ;;  %2583 = vmatpush3.bf16.msra.mxu1 %v2919_v20  ;;  %v2920_v52 = vld [vmem:[#allocation14] sm:$0xff]   ;;  %v2921_v54 = vld [vmem:[#allocation13 + $0x48] sm:$0xff]  }
 0x11f   : > { %v727_v21 = vsel %vm724_vm0, %v716_v14, %v2421_v16  ;;  %728 = vst [vmem:[#allocation2] sm:$0xf] %v2422_v17  ;;  %v2922_v55 = vld [vmem:[#allocation13 + $0x8] sm:$0xff]   ;;  %2584 = vmatprep.subr.bf16.mxu1 %v2921_v54  ;;  %v2924_v57 = vld [vmem:[#allocation13 + $0x50] sm:$0xff]   ;;  %v2927_v60 = vld [vmem:[#allocation13 + $0x58] sm:$0xff]   ;;  %vm1346_vm5 = vcmask 1044480  }
 0x120   : > { %2565 = vmatpush3.bf16.msra.mxu0 %v2905_v6  ;;  %v730_v24 = vshrl.u32 %v727_v21, 16  ;;  %v732_v25 = vshll.u32 %v727_v21, 16  ;;  %v739_v27 = vrot.slane %v737_v22, 1  ;;  %v787_v28 = vrot.slane %v741_v23, 3  ;;  %v2923_v56 = vld [vmem:[#allocation14 + $0x8] sm:$0xff]   ;;  %v2925_v58 = vld [vmem:[#allocation13 + $0x10] sm:$0xff]  }
 0x121   : > { %2566 = vmatprep.subr.bf16.mxu0 %v2906_v7  ;;  %v788_v33 = vrot.slane %v737_v22, 4  ;;  %v2926_v59 = vld [vmem:[#allocation14 + $0x10] sm:$0xff]   ;;  %v2928_v61 = vld [vmem:[#allocation13 + $0x18] sm:$0xff]   ;;  %v2930_v63 = vld [vmem:[#allocation13 + $0x60] sm:$0xff]   ;;  %s4043_s14 = sld [smem:[#allocation37_spill]]  ;;  %vm1819_vm6 = vcmask 1045504  }
 0x122   : > { %v734_v30 = vrot.slane %v732_v25, 1  ;;  %v784_v31 = vrot.slane %v730_v24, 3  ;;  %v785_v32 = vrot.slane %v732_v25, 4  ;;  %v743_v34 = vor.u32 %v741_v23, %v739_v27  ;;  %2585 = vmatpush3.bf16.msra.mxu1 %v2922_v55  ;;  %v2929_v62 = vld [vmem:[#allocation14 + $0x18] sm:$0xff]   ;;  %v2931_v0 = vld [vmem:[#allocation13 + $0x20] sm:$0xff]   ;;  %v2933_v2 = vld [vmem:[#allocation13 + $0x68] sm:$0xff]  }
 0x123   : > { %v789_v45 = vor.u32 %v788_v33, %v787_v28  ;;  %2586 = vmatprep.subr.bf16.mxu1 %v2924_v57  ;;  %v2932_v1 = vld [vmem:[#allocation14 + $0x20] sm:$0xff]   ;;  %v2934_v3 = vld [vmem:[#allocation13 + $0x28] sm:$0xff]   ;;  %v2936_v4 = vld [vmem:[#allocation13 + $0x70] sm:$0xff]   ;;  %s4047_s8 = sld [smem:[#allocation30_spill]]  ;;  %s4048_s30 = sld [smem:[#allocation41_spill]] }
 0x124   : > { %2567 = vmatpush3.bf16.msra.mxu0 %v2907_v8  ;;  %v735_v35 = vor.u32 %v734_v30, %v730_v24  ;;  %v800_v37 = vshrl.u32 %v743_v34, 16  ;;  %v803_v38 = vshll.u32 %v743_v34, 16  ;;  %v786_v44 = vor.u32 %v785_v32, %v784_v31  ;;  %v2935_v5 = vld [vmem:[#allocation14 + $0x28] sm:$0xff]   ;;  %v2937_v6 = vld [vmem:[#allocation13 + $0x30] sm:$0xff]   ;;  %v2939_v7 = vld [vmem:[#allocation13 + $0x78] sm:$0xff]   ;;  %s4049_s0 = sld [smem:[#allocation42_spill]] }
 0x125   : > { %2568 = vmatprep.subr.bf16.mxu0 %v2908_v9  ;;  %v2938_v8 = vld [vmem:[#allocation14 + $0x30] sm:$0xff]   ;;  %v2940_v9 = vld [vmem:[#allocation13 + $0x38] sm:$0xff]   ;;  %v2943_v14 = vld [vmem:[#allocation16 + $0x40] sm:$0xff]   ;;  %p4050_p9 = scmp.ne.s32.totalorder %s4032_s21, 0 }
 0x126   : > { %v740_v39 = vsel %vm729_vm1, %v735_v35, %v739_v27  ;;  %v802_v42 = vrot.slane %v800_v37, 3  ;;  %v805_v43 = vrot.slane %v803_v38, 4  ;;  %v790_v50 = vsel %vm783_vm2, %v786_v44, %v789_v45  ;;  %2587 = vmatpush3.bf16.msra.mxu1 %v2925_v58  ;;  %v2423_v16 = vld [vmem:[%s4040_s17] ss:$0 sm:$0xff]  ;;  %v950_v25 = vld [vmem:[#allocation3] sm:$0xf] }
 0x127   : > { %v792_v40 = vshrl.u32 %v740_v39, 16  ;;  %v795_v41 = vshll.u32 %v740_v39, 16  ;;  %2588 = vmatprep.subr.bf16.mxu1 %v2927_v60  ;;  %v2944_v54 = vld [vmem:[#allocation16] sm:$0xff]   ;;  %v2946_v58 = vld [vmem:[#allocation16 + $0x8] sm:$0xff]   ;;  %v2948_v60 = vld [vmem:[#allocation16 + $0x10] sm:$0xff]   ;;  %s4044_s17 = sld [smem:[#allocation38_spill]] }
 0x128   : > { %2569 = vmatpush3.bf16.msra.mxu0 %v2909_v10  ;;  %v806_v48 = vor.u32 %v805_v43, %v802_v42  ;;  %v2941_v10 = vld [vmem:[#allocation14 + $0x38] sm:$0xff]  }
 0x129   : > { %2570 = vmatprep.subr.bf16.mxu0 %v2910_v11  ;;  %v794_v46 = vrot.slane %v792_v40, 3  ;;  %v797_v47 = vrot.slane %v795_v41, 4  ;;  %v2458_v11 = vcombine.low %v3833_v12, %v3836_v13  ;;  %s2554_s18 = sshll.u32 %s4047_s8, 7 }
 0x12a   : > { %2589 = vmatpush3.bf16.msra.mxu1 %v2928_v61  ;;  %s3930_s2 = scalar_lea.hbm %s4049_s0, %s2554_s18 }
 0x12b   : > { %v798_v49 = vor.u32 %v797_v47, %v794_v46  ;;  %2590 = vmatprep.subr.bf16.mxu1 %v2930_v63  ;;  %v2949_v63 = vld [vmem:[#allocation16 + $0x58] sm:$0xff]  }
 0x12c   : > { %2571 = vmatpush3.bf16.msra.mxu0 %v2911_v15 }
 0x12d   : > { %2572 = vmatprep.subr.bf16.mxu0 %v2912_v19  ;;  %v807_v51 = vsel %vm783_vm2, %v798_v49, %v806_v48 }
 0x12e   : > { %938 = vmatprep.mubr.bf16.mxu0 %v807_v51  ;;  %2591 = vmatpush3.bf16.msra.mxu1 %v2931_v0 }
 0x12f   : > { %2592 = vmatprep.subr.bf16.mxu1 %v2933_v2 }
 0x130   : > { %2573 = vmatpush3.bf16.msra.mxu0 %v2913_v26 }
 0x131   : > { %2574 = vmatprep.subr.bf16.mxu0 %v2914_v29 }
 0x132   : > { %2593 = vmatpush3.bf16.msra.mxu1 %v2934_v3  ;;  %v2951_v3 = vld [vmem:[#allocation16 + $0x60] sm:$0xff]  }
 0x133   : > { %2594 = vmatprep.subr.bf16.mxu1 %v2936_v4  ;;  %v2952_v4 = vld [vmem:[#allocation16 + $0x20] sm:$0xff]  }
 0x134   : > { %2575 = vmatpush3.bf16.msra.mxu0 %v2915_v36 }
 0x135   : > { %2710 = vmatprep.subr.bf16.mxu0 %v3381_v53 }
 0x136   : > { %2595 = vmatpush3.bf16.msra.mxu1 %v2937_v6  ;;  %v2954_v6 = vld [vmem:[#allocation16 + $0x28] sm:$0xff]  }
 0x137   : > { %939 = vmatmul.mubr.bf16.vlgmr.msra.gmra.mrb[0].mxu0 %v790_v50  ;;  %2596 = vmatprep.subr.bf16.mxu1 %v2939_v7  ;;  %v2955_v7 = vld [vmem:[#allocation16 + $0x70] sm:$0xff]  }
 0x138   : > { %2711 = vmatpush3.bf16.msra.mxu0 %v2920_v52  ;;  %2726 = vmatprep.mubr.msk.bf16.mxu0 %vm3382_vm3, %v3381_v53 }
 0x139   : > { %2712 = vmatprep.subr.bf16.mxu0 %v3381_v53 }
 0x13a   : > { %2597 = vmatpush3.bf16.msra.mxu1 %v2940_v9  ;;  %v2957_v9 = vld [vmem:[#allocation16 + $0x78] sm:$0xff]  }
 0x13b   : > { %2613 = vmatprep.subr.bf16.mxu1 %v2943_v14  ;;  %v2968_v14 = vld [vmem:[#allocation17] sm:$0xff]  }
 0x13c   : > { %2713 = vmatpush3.bf16.msra.mxu0 %v2923_v56  ;;  %v2945_v56 = vld [vmem:[#allocation16 + $0x48] sm:$0xff]  }
 0x13d   : > { %2714 = vmatprep.subr.bf16.mxu0 %v3381_v53 }
 0x140   : > { %2715 = vmatpush3.bf16.msra.mxu0 %v2926_v59  ;;  %v2947_v59 = vld [vmem:[#allocation16 + $0x50] sm:$0xff]  }
 0x141   : > { %2716 = vmatprep.subr.bf16.mxu0 %v3381_v53 }
 0x144   : > { %2717 = vmatpush3.bf16.msra.mxu0 %v2929_v62 }
 0x145   : > { %2718 = vmatprep.subr.bf16.mxu0 %v3381_v53 }
 0x148   : > { %2719 = vmatpush3.bf16.msra.mxu0 %v2932_v1  ;;  %v2950_v1 = vld [vmem:[#allocation16 + $0x18] sm:$0xff]  }
 0x149   : > { %2720 = vmatprep.subr.bf16.mxu0 %v3381_v53 }
 0x14c   : > { %2721 = vmatpush3.bf16.msra.mxu0 %v2935_v5  ;;  %v2953_v5 = vld [vmem:[#allocation16 + $0x68] sm:$0xff]  }
 0x14d   : > { %2722 = vmatprep.subr.bf16.mxu0 %v3381_v53 }
 0x150   : > { %2723 = vmatpush3.bf16.msra.mxu0 %v2938_v8  ;;  %v2956_v8 = vld [vmem:[#allocation16 + $0x30] sm:$0xff]  }
 0x151   : > { %2724 = vmatprep.subr.bf16.mxu0 %v3381_v53 }
 0x154   : > { %2725 = vmatpush3.bf16.msra.mxu0 %v2941_v10  ;;  %v2958_v10 = vld [vmem:[#allocation16 + $0x38] sm:$0xff]  }
 0x157   : > { %2727 = vmatmul.mubr.bf16.vlgmr.msra.gmra.mrb[4].mxu0 %v2458_v11  ;;  %v2967_v11 = vld [vmem:[#allocation17 + $0x40] sm:$0xff]  }
 0x158   : > { %2635 = vmatprep.subr.bf16.mxu0 %v2967_v11 }
 0x159   : > { %2636 = vmatpush3.bf16.msra.mxu0 %v2968_v14 }
 0x20a   : > { %v2576_v15 = vpop.f32.mrb[0].mxu0 }
 0x20b   : > { %v2577_v17 = vpop.f32.mrb[1].mxu0 }
 0x20c   : > { %v2578_v18 = vadd.f32 %v2577_v17, %v2576_v15  ;;  %v2579_v19 = vpop.f32.mrb[2].mxu0  ;;  %v2969_v15 = vld [vmem:[#allocation17 + $0x48] sm:$0xff]   ;;  %v2971_v17 = vld [vmem:[#allocation17 + $0x50] sm:$0xff]  }
 0x20d   : > { %v2580_v20 = vpop.f32.mrb[3].mxu0  ;;  %2637 = vmatprep.subr.bf16.mxu0 %v2969_v15 }
 0x20e   : > { %v941_v21 = vadd.f32 %v2578_v18, %v2423_v16  ;;  %v2581_v22 = vadd.f32 %v2580_v20, %v2579_v19  ;;  %v2972_v18 = vld [vmem:[#allocation17 + $0x10] sm:$0xff]   ;;  %v2440_v20 = vld [vmem:[%s4041_s27] ss:$0 sm:$0xff]  ;;  %s4045_s27 = sld [smem:[#allocation39_spill]] }
 0x210   : > { %v944_v23 = vadd.f32 %v2581_v22, %v2423_v16  ;;  %v947_v12 = vmax.f32 %v941_v21, 0.0  ;;  %v2970_v16 = vld [vmem:[#allocation17 + $0x8] sm:$0xff]   ;;  %v2457_v22 = vld [vmem:[%s4042_s6] ss:$0 sm:$0xff]  ;;  %s4046_s6 = sld [smem:[#allocation40_spill]] }
 0x211   : > { %2638 = vmatpush3.bf16.msra.mxu0 %v2970_v16 }
 0x212   : > { %v948_v13 = vmax.f32 %v944_v23, 0.0  ;;  %2639 = vmatprep.subr.bf16.mxu0 %v2971_v17  ;;  %v1495_v17 = vld [vmem:[#allocation5] sm:$0xf] }
 0x214   : > { %v949_v24 = vpack.c.bf16 %v948_v13, %v947_v12 }
 0x215   : > { %2640 = vmatpush3.bf16.msra.mxu0 %v2972_v18 }
 0x216   : > { %v952_v26 = vrot.slane %v949_v24, 4 }
 0x218   : > { %v956_v27 = vsel %vm724_vm0, %v950_v25, %v952_v26  ;;  %957 = vst [vmem:[#allocation3] sm:$0xf] %v952_v26  ;;  %v964_v28 = vshll.u32 %v952_v26, 16  ;;  %v968_v31 = vshrl.u32 %v952_v26, 16 }
 0x219   : > { %v960_v29 = vshll.u32 %v956_v27, 16  ;;  %v958_v32 = vshrl.u32 %v956_v27, 16 }
 0x21a   : > { %v966_v30 = vrot.slane %v964_v28, 1  ;;  %v1013_v38 = vrot.slane %v968_v31, 3  ;;  %v1014_v42 = vrot.slane %v964_v28, 4 }
 0x21b   : > { %v962_v33 = vrot.slane %v960_v29, 1  ;;  %v1010_v40 = vrot.slane %v958_v32, 3  ;;  %v1011_v41 = vrot.slane %v960_v29, 4 }
 0x21c   : > { %v970_v34 = vor.u32 %v968_v31, %v966_v30  ;;  %v1015_v50 = vor.u32 %v1014_v42, %v1013_v38 }
 0x21d   : > { %v963_v35 = vor.u32 %v962_v33, %v958_v32  ;;  %v1012_v49 = vor.u32 %v1011_v41, %v1010_v40 }
 0x21e   : > { %v1026_v36 = vshrl.u32 %v970_v34, 16  ;;  %v1029_v37 = vshll.u32 %v970_v34, 16 }
 0x21f   : > { %v967_v39 = vsel %vm729_vm1, %v963_v35, %v966_v30  ;;  %v1016_v57 = vsel %vm783_vm2, %v1012_v49, %v1015_v50  ;;  %v2960_v49 = vld [vmem:[#allocation19 + $0x8] sm:$0xff]   ;;  %v2961_v50 = vld [vmem:[#allocation19 + $0x10] sm:$0xff]  }
 0x220   : > { %v1018_v43 = vshrl.u32 %v967_v39, 16  ;;  %v1021_v44 = vshll.u32 %v967_v39, 16  ;;  %v1028_v45 = vrot.slane %v1026_v36, 3  ;;  %v1031_v46 = vrot.slane %v1029_v37, 4  ;;  %v1294_v36 = vld [vmem:[#allocation4] sm:$0xf] }
 0x222   : > { %v1020_v47 = vrot.slane %v1018_v43, 3  ;;  %v1023_v48 = vrot.slane %v1021_v44, 4  ;;  %v1032_v52 = vor.u32 %v1031_v46, %v1028_v45  ;;  %v2959_v46 = vld [vmem:[#allocation19] sm:$0xff]  }
 0x224   : > { %v1024_v51 = vor.u32 %v1023_v48, %v1020_v47 }
 0x226   : > { %v1033_v55 = vsel %vm783_vm2, %v1024_v51, %v1032_v52  ;;  %v2962_v51 = vld [vmem:[#allocation19 + $0x18] sm:$0xff]   ;;  %v2963_v52 = vld [vmem:[#allocation19 + $0x20] sm:$0xff]  }
 0x227   : > { %1164 = vmatprep.mubr.bf16.mxu1 %v1033_v55  ;;  %v2965_v55 = vld [vmem:[#allocation19 + $0x30] sm:$0xff]  }
 0x228   : > { %1165 = vmatmul.mubr.bf16.vlgmr.msra.gmra.mrb[0].mxu1 %v1016_v57  ;;  %v2973_v57 = vld [vmem:[#allocation17 + $0x58] sm:$0xff]  }
 0x229   : > { %2614 = vmatpush3.bf16.msra.mxu1 %v2944_v54  ;;  %v2964_v54 = vld [vmem:[#allocation19 + $0x28] sm:$0xff]   ;;  %2641 = vmatprep.subr.bf16.mxu0 %v2973_v57 }
 0x22a   : > { %2615 = vmatprep.subr.bf16.mxu1 %v2945_v56  ;;  %v1282_v61 = vpop.f32.mrb[4].mxu0  ;;  %v2966_v56 = vld [vmem:[#allocation19 + $0x38] sm:$0xff]  }
 0x22b   : > { %v2728_v62 = vpop.f32.mrb[5].mxu0  ;;  %v1283_v25 = vadd.f32 %v2457_v22, %v1282_v61  ;;  %v2977_v61 = vld [vmem:[#allocation17 + $0x68] sm:$0xff]  }
 0x22c   : > { %v1285_v0 = vpop.f32.mrb[6].mxu0  ;;  %v2978_v62 = vld [vmem:[#allocation17 + $0x28] sm:$0xff]  }
 0x22d   : > { %2616 = vmatpush3.bf16.msra.mxu1 %v2946_v58  ;;  %v2729_v2 = vpop.f32.mrb[7].mxu0  ;;  %v1286_v31 = vadd.f32 %v2457_v22, %v1285_v0  ;;  %v2974_v58 = vld [vmem:[#allocation17 + $0x18] sm:$0xff]   ;;  %v2980_v0 = vld [vmem:[#allocation17 + $0x30] sm:$0xff]  }
 0x22e   : > { %2617 = vmatprep.subr.bf16.mxu1 %v2947_v59  ;;  %2642 = vmatpush3.bf16.msra.mxu0 %v2974_v58  ;;  %v2975_v59 = vld [vmem:[#allocation17 + $0x60] sm:$0xff]   ;;  %v2501_v58 = vld [vmem:[%s4045_s27] ss:$0 sm:$0xff] }
 0x22f   : > { %2643 = vmatprep.subr.bf16.mxu0 %v2975_v59  ;;  %v2983_v2 = vld [vmem:[#allocation20 + $0x40] sm:$0xff]  }
 0x231   : > { %2618 = vmatpush3.bf16.msra.mxu1 %v2948_v60  ;;  %v2976_v60 = vld [vmem:[#allocation17 + $0x20] sm:$0xff]  }
 0x232   : > { %2619 = vmatprep.subr.bf16.mxu1 %v2949_v63  ;;  %2644 = vmatpush3.bf16.msra.mxu0 %v2976_v60  ;;  %v2979_v63 = vld [vmem:[#allocation17 + $0x70] sm:$0xff]  }
 0x233   : > { %2645 = vmatprep.subr.bf16.mxu0 %v2977_v61 }
 0x235   : > { %2620 = vmatpush3.bf16.msra.mxu1 %v2950_v1  ;;  %v2981_v1 = vld [vmem:[#allocation17 + $0x78] sm:$0xff]  }
 0x236   : > { %2621 = vmatprep.subr.bf16.mxu1 %v2951_v3  ;;  %2646 = vmatpush3.bf16.msra.mxu0 %v2978_v62 }
 0x237   : > { %2647 = vmatprep.subr.bf16.mxu0 %v2979_v63 }
 0x239   : > { %2622 = vmatpush3.bf16.msra.mxu1 %v2952_v4  ;;  %v2467_v4 = vld [vmem:[%s4043_s14] ss:$0 sm:$0xff] }
 0x23a   : > { %2623 = vmatprep.subr.bf16.mxu1 %v2953_v5  ;;  %2648 = vmatpush3.bf16.msra.mxu0 %v2980_v0 }
 0x23b   : > { %2649 = vmatprep.subr.bf16.mxu0 %v2981_v1 }
 0x23d   : > { %2624 = vmatpush3.bf16.msra.mxu1 %v2954_v6 }
 0x23e   : > { %2625 = vmatprep.subr.bf16.mxu1 %v2955_v7 }
 0x241   : > { %2626 = vmatpush3.bf16.msra.mxu1 %v2956_v8 }
 0x242   : > { %2627 = vmatprep.subr.bf16.mxu1 %v2957_v9 }
 0x245   : > { %2628 = vmatpush3.bf16.msra.mxu1 %v2958_v10 }
 0x246   : > { %2730 = vmatprep.subr.bf16.mxu1 %v3381_v53 }
 0x2fb   : > { %v2598_v19 = vpop.f32.mrb[0].mxu1 }
 0x2fc   : > { %v2599_v21 = vpop.f32.mrb[1].mxu1 }
 0x2fd   : > { %v2600_v23 = vadd.f32 %v2599_v21, %v2598_v19  ;;  %v2601_v12 = vpop.f32.mrb[2].mxu1 }
 0x2fe   : > { %v2602_v13 = vpop.f32.mrb[3].mxu1 }
 0x2ff   : > { %v1167_v24 = vadd.f32 %v2600_v23, %v2440_v20  ;;  %v2603_v26 = vadd.f32 %v2602_v13, %v2601_v12 }
 0x301   : > { %v1173_v27 = vmax.f32 %v1167_v24, 0.0  ;;  %v1170_v28 = vadd.f32 %v2603_v26, %v2440_v20 }
 0x303   : > { %v1289_v29 = vadd.f32 %v1283_v25, %v1173_v27  ;;  %v1174_v30 = vmax.f32 %v1170_v28, 0.0  ;;  %v2984_v25 = vld [vmem:[#allocation20] sm:$0xff]   ;;  %v2985_v27 = vld [vmem:[#allocation20 + $0x48] sm:$0xff]  }
 0x305   : > { %v1290_v32 = vadd.f32 %v1286_v31, %v1174_v30  ;;  %v1291_v33 = vmax.f32 %v1289_v29, 0.0  ;;  %v2986_v29 = vld [vmem:[#allocation20 + $0x8] sm:$0xff]  }
 0x307   : > { %v1292_v34 = vmax.f32 %v1290_v32, 0.0 }
 0x309   : > { %v1293_v35 = vpack.c.bf16 %v1292_v34, %v1291_v33  ;;  %v2987_v34 = vld [vmem:[#allocation20 + $0x50] sm:$0xff]  }
 0x30b   : > { %v1296_v37 = vrot.slane %v1293_v35, 4 }
 0x30d   : > { %v1300_v38 = vsel %vm724_vm0, %v1294_v36, %v1296_v37  ;;  %1301 = vst [vmem:[#allocation4] sm:$0xf] %v1296_v37  ;;  %v1305_v39 = vrot.slane %v1296_v37, 1  ;;  %v1348_v43 = vrot.slane %v1296_v37, 3  ;;  %v2989_v36 = vld [vmem:[#allocation20 + $0x58] sm:$0xff]  }
 0x30e   : > { %v1304_v40 = vrot.slane %v1300_v38, 1  ;;  %v1347_v42 = vrot.slane %v1300_v38, 3  ;;  %v2990_v37 = vld [vmem:[#allocation20 + $0x18] sm:$0xff]   ;;  %v2991_v38 = vld [vmem:[#allocation20 + $0x60] sm:$0xff]  }
 0x30f   : > { %v1351_v45 = vrot.slane %v1305_v39, 3 }
 0x310   : > { %v1306_v41 = vsel %vm1303_vm4, %v1304_v40, %v1305_v39  ;;  %v1349_v48 = vsel %vm1346_vm5, %v1347_v42, %v1348_v43  ;;  %v2992_v39 = vld [vmem:[#allocation20 + $0x20] sm:$0xff]   ;;  %v2993_v40 = vld [vmem:[#allocation20 + $0x68] sm:$0xff]   ;;  %v2995_v42 = vld [vmem:[#allocation20 + $0x70] sm:$0xff]  }
 0x311   : > { %v1350_v44 = vrot.slane %v1306_v41, 3  ;;  %v2994_v41 = vld [vmem:[#allocation20 + $0x28] sm:$0xff]   ;;  %v2996_v43 = vld [vmem:[#allocation20 + $0x30] sm:$0xff]  }
 0x313   : > { %v1352_v47 = vsel %vm1346_vm5, %v1350_v44, %v1351_v45  ;;  %v2997_v44 = vld [vmem:[#allocation20 + $0x78] sm:$0xff]  }
 0x314   : > { %1483 = vmatprep.mubr.bf16.mxu1 %v1352_v47  ;;  %v2998_v45 = vld [vmem:[#allocation20 + $0x38] sm:$0xff]   ;;  %v3000_v47 = vld [vmem:[#allocation22] sm:$0xff]  }
 0x315   : > { %1484 = vmatmul.mubr.bf16.vlgmr.msra.gmra.mrb[4].mxu1 %v1349_v48  ;;  %v3001_v48 = vld [vmem:[#allocation22 + $0x48] sm:$0xff]  }
 0x316   : > { %2731 = vmatpush3.bf16.msra.mxu1 %v2959_v46  ;;  %2746 = vmatprep.mubr.msk.bf16.mxu1 %vm3382_vm3, %v3381_v53  ;;  %v2999_v46 = vld [vmem:[#allocation22 + $0x40] sm:$0xff]  }
 0x317   : > { %2732 = vmatprep.subr.bf16.mxu1 %v3381_v53 }
 0x31a   : > { %2733 = vmatpush3.bf16.msra.mxu1 %v2960_v49  ;;  %v3002_v49 = vld [vmem:[#allocation22 + $0x8] sm:$0xff]  }
 0x31b   : > { %2734 = vmatprep.subr.bf16.mxu1 %v3381_v53 }
 0x31e   : > { %2735 = vmatpush3.bf16.msra.mxu1 %v2961_v50  ;;  %v3003_v50 = vld [vmem:[#allocation22 + $0x50] sm:$0xff]  }
 0x31f   : > { %2736 = vmatprep.subr.bf16.mxu1 %v3381_v53 }
 0x322   : > { %2737 = vmatpush3.bf16.msra.mxu1 %v2962_v51  ;;  %v3004_v51 = vld [vmem:[#allocation22 + $0x10] sm:$0xff]  }
 0x323   : > { %2738 = vmatprep.subr.bf16.mxu1 %v3381_v53 }
 0x326   : > { %2739 = vmatpush3.bf16.msra.mxu1 %v2963_v52 }
 0x327   : > { %2740 = vmatprep.subr.bf16.mxu1 %v3381_v53 }
 0x32a   : > { %2741 = vmatpush3.bf16.msra.mxu1 %v2964_v54  ;;  %v2484_v54 = vld [vmem:[%s4044_s17] ss:$0 sm:$0xff]  ;;  %s700_s17 = scalar_lea.vmem [#allocation23], %s2411_s1  ;;  %s3383_s1 = smov [#allocation23]  }
 0x32b   : > { %2742 = vmatprep.subr.bf16.mxu1 %v3381_v53  ;;  %s2232_s19 = sshll.u32 %s700_s17, 4  ;;  %s3273_s8 = sshll.u32 %s3383_s1, 4  ;;  %s3932_s19 = int_to_ptr.vmem [resolvable:$true] %s2232_s19  ;;  %s3274_s8 = int_to_ptr.vmem [resolvable:$false] %s3273_s8 }
 0x32c   : > { %s3269_s22 = scalar_lea.vmem %s3932_s19, 128  ;;  %s3275_s14 = scalar_lea.vmem %s3274_s8, 256 }
 0x32d   : > { %p3270_p2 = scmp.ne.s32.totalorder %s3932_s19, %s3269_s22  ;;  %p3276_p0 = scmp.lt.s32.totalorder %s3932_s19, %s3274_s8 }
 0x32e   : > { %2743 = vmatpush3.bf16.msra.mxu1 %v2965_v55  ;;  %p3277_p7 = scmp.lt.s32.totalorder %s3275_s14, %s3269_s22 }
 0x32f   : > { %2744 = vmatprep.subr.bf16.mxu1 %v3381_v53  ;;  %v2982_v53 = vld [vmem:[#allocation17 + $0x38] sm:$0xff]   ;;  %p3271_p10 = pnand %p3270_p2, %p4050_p9 }
 0x330   : > { %2650 = vmatpush3.bf16.msra.mxu0 %v2982_v53  ;;  %p3278_p5 = por %p3277_p7, %p3276_p0 }
 0x331   : > { %2666 = vmatprep.subr.bf16.mxu0 %v2983_v2  ;;  %p3272_p12 = pneg %p3271_p10 }
 0x332   : > { %2745 = vmatpush3.bf16.msra.mxu1 %v2966_v56 }
 0x333   : > { %2688 = vmatprep.subr.bf16.mxu1 %v2999_v46  ;;  %p3279_p8 = pnand %p3278_p5, %p3272_p12 }
 0x335   : > { %2747 = vmatmul.mubr.bf16.vlgmr.msra.gmra.mrb[8].mxu1 %v1293_v35  ;;  %v2988_v35 = vld [vmem:[#allocation20 + $0x10] sm:$0xff]  }
 0x336   : > { %2689 = vmatpush3.bf16.msra.mxu1 %v3000_v47 }
 0x337   : > { %2690 = vmatprep.subr.bf16.mxu1 %v3001_v48  ;;  %v2527_v48 = vld [vmem:[%s4048_s30] ss:$0 sm:$0xff] }
 0x33a   : > { %2691 = vmatpush3.bf16.msra.mxu1 %v3002_v49 }
 0x33b   : > { %2692 = vmatprep.subr.bf16.mxu1 %v3003_v50 }
 0x33e   : > { %2693 = vmatpush3.bf16.msra.mxu1 %v3004_v51 }
 0x3e8   : > { %v2629_v3 = vpop.f32.mrb[4].mxu1 }
 0x3e9   : > { %v2630_v5 = vpop.f32.mrb[5].mxu1 }
 0x3ea   : > { %v2631_v6 = vadd.f32 %v2630_v5, %v2629_v3  ;;  %v2632_v7 = vpop.f32.mrb[6].mxu1 }
 0x3eb   : > { %v2633_v8 = vpop.f32.mrb[7].mxu1 }
 0x3ec   : > { %v1486_v9 = vadd.f32 %v2631_v6, %v2467_v4  ;;  %v2634_v10 = vadd.f32 %v2633_v8, %v2632_v7  ;;  %v1810_v7 = vld [vmem:[#allocation6] sm:$0xf] }
 0x3ee   : > { %v1489_v11 = vadd.f32 %v2634_v10, %v2467_v4  ;;  %v1492_v14 = vmax.f32 %v1486_v9, 0.0 }
 0x3f0   : > { %v1493_v15 = vmax.f32 %v1489_v11, 0.0 }
 0x3f2   : > { %v1494_v16 = vpack.c.bf16 %v1493_v15, %v1492_v14 }
 0x3f4   : > { %v1497_v18 = vrot.slane %v1494_v16, 4 }
 0x3f6   : > { %1502 = vst [vmem:[#allocation5] sm:$0xf] %v1497_v18  ;;  %v1501_v19 = vsel %vm724_vm0, %v1495_v17, %v1497_v18  ;;  %v1505_v20 = vrot.slane %v1497_v18, 1  ;;  %v1547_v12 = vrot.slane %v1497_v18, 3  ;;  %v3005_v18 = vld [vmem:[#allocation22 + $0x58] sm:$0xff]  }
 0x3f7   : > { %v1504_v21 = vrot.slane %v1501_v19, 1  ;;  %v1546_v23 = vrot.slane %v1501_v19, 3  ;;  %v3006_v19 = vld [vmem:[#allocation22 + $0x18] sm:$0xff]   ;;  %2694 = vmatprep.subr.bf16.mxu1 %v3005_v18 }
 0x3f8   : > { %v1550_v24 = vrot.slane %v1505_v20, 3  ;;  %2695 = vmatpush3.bf16.msra.mxu1 %v3006_v19 }
 0x3f9   : > { %v1506_v22 = vsel %vm1303_vm4, %v1504_v21, %v1505_v20  ;;  %v1548_v28 = vsel %vm1346_vm5, %v1546_v23, %v1547_v12  ;;  %v3007_v20 = vld [vmem:[#allocation22 + $0x60] sm:$0xff]   ;;  %v3010_v23 = vld [vmem:[#allocation22 + $0x28] sm:$0xff]   ;;  %v3011_v12 = vld [vmem:[#allocation22 + $0x70] sm:$0xff]  }
 0x3fa   : > { %v1549_v13 = vrot.slane %v1506_v22, 3  ;;  %v3008_v21 = vld [vmem:[#allocation22 + $0x20] sm:$0xff]   ;;  %2696 = vmatprep.subr.bf16.mxu1 %v3007_v20  ;;  %v3009_v22 = vld [vmem:[#allocation22 + $0x68] sm:$0xff]  }
 0x3fc   : > { %v1551_v26 = vsel %vm1346_vm5, %v1549_v13, %v1550_v24  ;;  %2697 = vmatpush3.bf16.msra.mxu1 %v3008_v21  ;;  %v3012_v13 = vld [vmem:[#allocation22 + $0x30] sm:$0xff]   ;;  %v3013_v24 = vld [vmem:[#allocation22 + $0x78] sm:$0xff]  }
 0x3fd   : > { %1682 = vmatprep.mubr.bf16.mxu0 %v1551_v26  ;;  %2698 = vmatprep.subr.bf16.mxu1 %v3009_v22 }
 0x3fe   : > { %1683 = vmatmul.mubr.bf16.vlgmr.msra.gmra.mrb[8].mxu0 %v1548_v28 }
 0x3ff   : > { %2667 = vmatpush3.bf16.msra.mxu0 %v2984_v25  ;;  %v3014_v25 = vld [vmem:[#allocation22 + $0x38] sm:$0xff]  }
 0x400   : > { %2668 = vmatprep.subr.bf16.mxu0 %v2985_v27  ;;  %2699 = vmatpush3.bf16.msra.mxu1 %v3010_v23  ;;  %v2510_v27 = vld [vmem:[%s4046_s6] ss:$0 sm:$0xff]  ;;  %s2217_s6 = scalar_lea.sflag [#allocation10], %s3804_s10 }
 0x401   : > { %2700 = vmatprep.subr.bf16.mxu1 %v3011_v12 }
 0x403   : > { %2669 = vmatpush3.bf16.msra.mxu0 %v2986_v29 }
 0x404   : > { %2670 = vmatprep.subr.bf16.mxu0 %v2987_v34  ;;  %2701 = vmatpush3.bf16.msra.mxu1 %v3012_v13 }
 0x405   : > { %2702 = vmatprep.subr.bf16.mxu1 %v3013_v24 }
 0x407   : > { %2671 = vmatpush3.bf16.msra.mxu0 %v2988_v35 }
 0x408   : > { %v1798_v30 = vpop.f32.mrb[8].mxu1  ;;  %2672 = vmatprep.subr.bf16.mxu0 %v2989_v36  ;;  %2703 = vmatpush3.bf16.msra.mxu1 %v3014_v25 }
 0x409   : > { %v2748_v31 = vpop.f32.mrb[9].mxu1  ;;  %v1799_v62 = vadd.f32 %v2501_v58, %v1798_v30 }
 0x40a   : > { %v1801_v32 = vpop.f32.mrb[10].mxu1 }
 0x40b   : > { %v2749_v33 = vpop.f32.mrb[11].mxu1  ;;  %2673 = vmatpush3.bf16.msra.mxu0 %v2990_v37  ;;  %v1802_v1 = vadd.f32 %v2501_v58, %v1801_v32 }
 0x40c   : > { %2674 = vmatprep.subr.bf16.mxu0 %v2991_v38  ;;  %v2007_v38 = vld [vmem:[#allocation7] sm:$0xf] }
 0x40f   : > { %2675 = vmatpush3.bf16.msra.mxu0 %v2992_v39 }
 0x410   : > { %2676 = vmatprep.subr.bf16.mxu0 %v2993_v40 }
 0x413   : > { %2677 = vmatpush3.bf16.msra.mxu0 %v2994_v41 }
 0x414   : > { %2678 = vmatprep.subr.bf16.mxu0 %v2995_v42 }
 0x417   : > { %2679 = vmatpush3.bf16.msra.mxu0 %v2996_v43 }
 0x418   : > { %2680 = vmatprep.subr.bf16.mxu0 %v2997_v44 }
 0x41b   : > { %2681 = vmatpush3.bf16.msra.mxu0 %v2998_v45 }
 0x4d1   : > { %v2651_v52 = vpop.f32.mrb[8].mxu0 }
 0x4d2   : > { %v2652_v55 = vpop.f32.mrb[9].mxu0 }
 0x4d3   : > { %v2653_v56 = vadd.f32 %v2652_v55, %v2651_v52  ;;  %v2654_v57 = vpop.f32.mrb[10].mxu0 }
 0x4d4   : > { %v2655_v59 = vpop.f32.mrb[11].mxu0 }
 0x4d5   : > { %v1685_v60 = vadd.f32 %v2653_v56, %v2484_v54  ;;  %v2656_v61 = vadd.f32 %v2655_v59, %v2654_v57 }
 0x4d7   : > { %v1691_v63 = vmax.f32 %v1685_v60, 0.0  ;;  %v1688_v0 = vadd.f32 %v2656_v61, %v2484_v54 }
 0x4d9   : > { %v3898_v53 = vadd.f32 %v1799_v62, %v1691_v63  ;;  %v1692_v2 = vmax.f32 %v1688_v0, 0.0 }
 0x4db   : > { %v3900_v3 = vadd.f32 %v1802_v1, %v1692_v2  ;;  %v1807_v4 = vmax.f32 %v3898_v53, 0.0 }
 0x4dd   : > { %v1808_v5 = vmax.f32 %v3900_v3, 0.0 }
 0x4df   : > { %v1809_v6 = vpack.c.bf16 %v1808_v5, %v1807_v4 }
 0x4e1   : > { %v1812_v8 = vrot.slane %v1809_v6, 4 }
 0x4e3   : > { %v1816_v9 = vsel %vm724_vm0, %v1810_v7, %v1812_v8  ;;  %1817 = vst [vmem:[#allocation6] sm:$0xf] %v1812_v8  ;;  %v1821_v10 = vrot.slane %v1812_v8, 2 }
 0x4e4   : > { %v1820_v11 = vrot.slane %v1816_v9, 2 }
 0x4e5   : > { %v1863_v16 = vrot.slane %v1821_v10, 2 }
 0x4e6   : > { %v1822_v14 = vsel %vm1819_vm6, %v1820_v11, %v1821_v10 }
 0x4e7   : > { %v1862_v15 = vrot.slane %v1822_v14, 2 }
 0x4e9   : > { %v1864_v17 = vsel %vm1819_vm6, %v1862_v15, %v1863_v16 }
 0x4ea   : > { %1995 = vmatprep.mubr.bf16.mxu0 %v1864_v17 }
 0x4eb   : > { %1996 = vmatmul.mubr.bf16.vlgmr.msra.gmra.mrb[12].mxu0 %v1822_v14 }
 0x5be   : > { %v2682_v26 = vpop.f32.mrb[12].mxu0 }
 0x5bf   : > { %v2683_v28 = vpop.f32.mrb[13].mxu0 }
 0x5c0   : > { %v2684_v29 = vadd.f32 %v2683_v28, %v2682_v26  ;;  %v2685_v30 = vpop.f32.mrb[14].mxu0 }
 0x5c1   : > { %v2686_v31 = vpop.f32.mrb[15].mxu0 }
 0x5c2   : > { %v1998_v32 = vadd.f32 %v2684_v29, %v2510_v27  ;;  %v2687_v33 = vadd.f32 %v2686_v31, %v2685_v30 }
 0x5c4   : > { %v2001_v34 = vadd.f32 %v2687_v33, %v2510_v27  ;;  %v2004_v35 = vmax.f32 %v1998_v32, 0.0 }
 0x5c6   : > { %v2005_v36 = vmax.f32 %v2001_v34, 0.0 }
 0x5c8   : > { %v2006_v37 = vpack.c.bf16 %v2005_v36, %v2004_v35 }
 0x5ca   : > { %v2009_v39 = vrot.slane %v2006_v37, 4 }
 0x5cc   : > { %v2013_v40 = vsel %vm724_vm0, %v2007_v38, %v2009_v39  ;;  %2014 = vst [vmem:[#allocation7] sm:$0xf] %v2009_v39  ;;  %v2017_v41 = vrot.slane %v2009_v39, 2 }
 0x5cd   : > { %v2016_v42 = vrot.slane %v2013_v40, 2 }
 0x5ce   : > { %v2059_v45 = vrot.slane %v2017_v41, 2 }
 0x5cf   : > { %v2018_v43 = vsel %vm1819_vm6, %v2016_v42, %v2017_v41 }
 0x5d0   : > { %v2058_v44 = vrot.slane %v2018_v43, 2 }
 0x5d2   : > { %v2060_v46 = vsel %vm1819_vm6, %v2058_v44, %v2059_v45 }
 0x5d3   : > { %2191 = vmatprep.mubr.bf16.mxu1 %v2060_v46 }
 0x5d4   : > { %2192 = vmatmul.mubr.bf16.vlgmr.msra.gmra.mrb[12].mxu1 %v2018_v43 }
 0x6a7   : > { %v2704_v47 = vpop.f32.mrb[12].mxu1 }
 0x6a8   : > { %v2705_v49 = vpop.f32.mrb[13].mxu1 }
 0x6a9   : > { %v2706_v50 = vadd.f32 %v2705_v49, %v2704_v47  ;;  %v2707_v51 = vpop.f32.mrb[14].mxu1 }
 0x6aa   : > { %v2708_v52 = vpop.f32.mrb[15].mxu1 }
 0x6ab   : > { %v2194_v54 = vadd.f32 %v2706_v50, %v2527_v48  ;;  %v2709_v55 = vadd.f32 %v2708_v52, %v2707_v51 }
 0x6ad   : > { %v2200_v56 = vmax.f32 %v2194_v54, 0.0  ;;  %v2197_v57 = vadd.f32 %v2709_v55, %v2527_v48 }
 0x6af   : > { %v2202_v58 = vadd.f32 %v2200_v56, %v1807_v4  ;;  %v2201_v59 = vmax.f32 %v2197_v57, 0.0 }
 0x6b1   : > { %v2203_v60 = vadd.f32 %v2201_v59, %v1808_v5  ;;  %v2204_v61 = vmax.f32 %v2202_v58, 0.0 }
 0x6b3   : > { %v2205_v62 = vmax.f32 %v2203_v60, 0.0 }
 0x6b5   : > { %v2558_v63 = vpack.c.bf16 %v2205_v62, %v2204_v61 }
 0x6b7   : > { %2559 = vst [vmem:[%s700_s17] sm:$0xff] %v2558_v63  }
 0x6b8   : > { %3282 = shalt.err (!%p3279_p8)
}
 0x6b9   : > { %s3283_s30 = scalar_lea.hbm %s3930_s2, 128  ;;  %s3287_s4 = scalar_lea.hbm %s4049_s0, 256 }
 0x6ba   : > { %p3284_p3 = scmp.ne.s32.totalorder %s3930_s2, %s3283_s30  ;;  %p3288_p13 = scmp.lt.u32.totalorder %s3930_s2, %s4049_s0 }
 0x6bb   : > { %p3289_p1 = scmp.lt.u32.totalorder %s3287_s4, %s3283_s30  ;;  %p3291_p2 = scmp.lt.u32.totalorder %s3283_s30, %s3930_s2 }
 0x6bc   : > { %p3285_p11 = pnand %p3284_p3, %p4050_p9 }
 0x6bd   : > { %p3290_p4 = por %p3289_p1, %p3288_p13 }
 0x6be   : > { %p3286_p6 = pneg %p3285_p11 }
 0x6bf   : > { %p3292_p10 = por %p3291_p2, %p3290_p4 }
 0x6c1   : > { %p3293_p12 = pnand %p3292_p10, %p3286_p6 }
 0x6c3   : > { %3296 = shalt.err (!%p3293_p12)
}
 0x6c4   : > { %s3384_s22 = smov 64   ;;  %s3385_s8 = smov 4  }
 0x6c5   : > { %2784 = dma.vmem_to_hbm [thread:$0]  (%p4050_p9), %s3932_s19, 128, %s3930_s2, %s2217_s6, %s3384_s22, %s3384_s22, %s3385_s8  }
 0x6c6 PF: > { %s2247_s14 = sand.u32 1, %s3347_s24   ;;  %p4051_p0 = scmp.ne.s32.totalorder %s4033_s12, 0 }
 0x6c7   : > { %p4052_p7 = scmp.ge.s32.totalorder %s3367_s29, 2  ;;  %s2248_s30 = scalar_lea.sflag [#allocation10], %s2247_s14 }
 0x6c9   : > { %p2816_p5 = pnand %p4052_p7, %p4051_p0 }
 0x6cb   : > { %3342 = dma.done.wait (!%p2816_p5), %s2248_s30, 128  }
 0x6cc   : > { %3344 = vsyncadd (!%p2816_p5), %s2248_s30, 4294967168  ;;  %s37_s29 = sadd.s32 1, %s3367_s29   ;;  %s4053_s24 = smov %s3351_s25 }
 0x6cd   : > { %p34_p8 = scmp.ge.s32.totalorder %s37_s29, 4   ;;  %s4054_s25 = smov %s3355_s26 }
 0x6ce   : > { %s4055_s26 = smov %s3748_s23  ;;  %s4056_s27 = smov %s3363_s28 }
 0x6cf   : > { %s4057_s28 = smov %s4059_s20  ;;  %36 = sbr.rel (!%p34_p8) target bundleno = 23 (0x17), region = 169 }
 0x6d6   :  { %2253 = vsyncpa [#allocation9], 1 }
 0x6d7   :  { %2255 = vsyncpa [#allocation9 + $0x1], 1 }
 0x6d8   :  { %2256 = vsyncpa [#allocation12], 1 }
 0x6d9   :  { %2257 = vsyncpa [#allocation15], 1 }
 0x6da   :  { %2258 = vsyncpa [#allocation18], 1 }
 0x6db   :  { %2259 = vsyncpa [#allocation21], 1 }
 0x6dc   :  { %2260 = vsyncpa [#allocation10], 1 }
 0x6dd   :  { %2262 = vsyncpa [#allocation10 + $0x1], 1 }

</bundles_post_ra>
